<compile_context>
chip_gen: v5e
topology: v5e:2x2
jax: 0.10.0
libtpu: 0.0.40
codegen_flags: <defaults>
</compile_context>

<pallas_src>
import math
import functools

import jax
import jax.numpy as jnp
from jax.experimental import pallas as pl
from jax.experimental.pallas import tpu as pltpu

_LN_EPS = 1e-5
_PARALLEL = pltpu.CompilerParams(dimension_semantics=("parallel",))


def _round_up(x, m):
    return ((x + m - 1) // m) * m


def _layernorm_f32(y, gamma, beta, eps):
    mean = jnp.mean(y, axis=-1, keepdims=True)
    var = jnp.mean(jnp.square(y - mean), axis=-1, keepdims=True)
    return (y - mean) * jax.lax.rsqrt(var + eps) * gamma + beta


# ---------------------------------------------------------------------------
# Plain linear (input embedding / output head)
# ---------------------------------------------------------------------------

def _linear_kernel(x_ref, w_ref, b_ref, o_ref):
    x = x_ref[0]                                             # (S, K) bf16
    y = jnp.dot(x, w_ref[...], preferred_element_type=jnp.float32)
    y = y + b_ref[...].astype(jnp.float32)
    o_ref[0] = y.astype(o_ref.dtype)


def pallas_linear(x, w, b, *, out_dtype):
    """x: [B, S, K] (bf16), w: [K, N] (bf16), b: [N] (f32) -> [B, S, N]."""
    B, S, K = x.shape
    Kw, N = w.shape
    assert K == Kw
    return pl.pallas_call(
        _linear_kernel,
        out_shape=jax.ShapeDtypeStruct((B, S, N), out_dtype),
        grid=(B,),
        in_specs=[
            pl.BlockSpec((1, S, K), lambda i: (i, 0, 0)),
            pl.BlockSpec((K, N), lambda i: (0, 0)),
            pl.BlockSpec((1, N), lambda i: (0, 0)),
        ],
        out_specs=pl.BlockSpec((1, S, N), lambda i: (i, 0, 0)),
        compiler_params=_PARALLEL,
    )(x, w, b.reshape(1, N))


# ---------------------------------------------------------------------------
# Fused self-attention sub-block:
#   LayerNorm( x + OutProj( MHA( InProj(x) ) ) )
# ---------------------------------------------------------------------------

def _attn_block_kernel(h_ref, win_ref, bin_ref, wout_ref, bout_ref, g_ref, beta_ref,
                       o_ref, *, nhead, eps):
    x = h_ref[0]                                             # (S, D) bf16
    S, D = x.shape
    dh = D // nhead
    sm_scale = 1.0 / math.sqrt(dh)

    # Fused QKV projection: one MXU pass, f32 accumulation.
    qkv = jnp.dot(x, win_ref[...], preferred_element_type=jnp.float32)
    qkv = qkv + bin_ref[...].astype(jnp.float32)             # (S, 3D) f32

    wout = wout_ref[...]                                     # (D, D) bf16
    acc = jnp.zeros((S, D), jnp.float32)
    for hi in range(nhead):                                  # static unroll over heads
        q = qkv[:, hi * dh:(hi + 1) * dh].astype(jnp.bfloat16)
        k = qkv[:, D + hi * dh:D + (hi + 1) * dh].astype(jnp.bfloat16)
        v = qkv[:, 2 * D + hi * dh:2 * D + (hi + 1) * dh].astype(jnp.bfloat16)
        s = jnp.dot(q, k.T, preferred_element_type=jnp.float32) * sm_scale
        s = s - jnp.max(s, axis=-1, keepdims=True)
        p = jnp.exp(s)
        p = p * pl.reciprocal(jnp.sum(p, axis=-1, keepdims=True), approx=True)
        ctx = jnp.dot(p.astype(jnp.bfloat16), v, preferred_element_type=jnp.float32)
        # Fold the head-concat + out-projection of this head straight into the
        # accumulator: concat(heads) @ Wout == sum_h head_h @ Wout[h*dh:(h+1)*dh, :].
        acc = acc + jnp.dot(ctx.astype(jnp.bfloat16), wout[hi * dh:(hi + 1) * dh, :],
                            preferred_element_type=jnp.float32)

    y = acc + bout_ref[...].astype(jnp.float32) + x.astype(jnp.float32)   # residual
    yn = _layernorm_f32(y, g_ref[...].astype(jnp.float32),
                        beta_ref[...].astype(jnp.float32), eps)
    o_ref[0] = yn.astype(o_ref.dtype)


def pallas_attention_block(h, win, bin_, wout, bout, gamma, beta, *, nhead, eps=_LN_EPS):
    B, S, D = h.shape
    assert D % nhead == 0
    kernel = functools.partial(_attn_block_kernel, nhead=nhead, eps=float(eps))
    return pl.pallas_call(
        kernel,
        out_shape=jax.ShapeDtypeStruct((B, S, D), h.dtype),
        grid=(B,),
        in_specs=[
            pl.BlockSpec((1, S, D), lambda i: (i, 0, 0)),
            pl.BlockSpec((D, 3 * D), lambda i: (0, 0)),
            pl.BlockSpec((1, 3 * D), lambda i: (0, 0)),
            pl.BlockSpec((D, D), lambda i: (0, 0)),
            pl.BlockSpec((1, D), lambda i: (0, 0)),
            pl.BlockSpec((1, D), lambda i: (0, 0)),
            pl.BlockSpec((1, D), lambda i: (0, 0)),
        ],
        out_specs=pl.BlockSpec((1, S, D), lambda i: (i, 0, 0)),
        compiler_params=_PARALLEL,
    )(h, win, bin_.reshape(1, 3 * D), wout, bout.reshape(1, D),
      gamma.reshape(1, D), beta.reshape(1, D))


# ---------------------------------------------------------------------------
# Fused feed-forward sub-block:
#   LayerNorm( x + W2 @ relu(W1 @ x + b1) + b2 )
# ---------------------------------------------------------------------------

def _ffn_block_kernel(h_ref, w1_ref, b1_ref, w2_ref, b2_ref, g_ref, beta_ref,
                      o_ref, *, eps):
    x = h_ref[0]                                             # (S, D) bf16
    mid = jnp.dot(x, w1_ref[...], preferred_element_type=jnp.float32)
    mid = jnp.maximum(mid + b1_ref[...].astype(jnp.float32), 0.0)   # (S, F) stays in VMEM
    y = jnp.dot(mid.astype(jnp.bfloat16), w2_ref[...],
                preferred_element_type=jnp.float32)
    y = y + b2_ref[...].astype(jnp.float32) + x.astype(jnp.float32)  # residual
    yn = _layernorm_f32(y, g_ref[...].astype(jnp.float32),
                        beta_ref[...].astype(jnp.float32), eps)
    o_ref[0] = yn.astype(o_ref.dtype)


def pallas_ffn_block(h, w1, b1, w2, b2, gamma, beta, *, eps=_LN_EPS):
    B, S, D = h.shape
    F = w1.shape[1]
    kernel = functools.partial(_ffn_block_kernel, eps=float(eps))
    return pl.pallas_call(
        kernel,
        out_shape=jax.ShapeDtypeStruct((B, S, D), h.dtype),
        grid=(B,),
        in_specs=[
            pl.BlockSpec((1, S, D), lambda i: (i, 0, 0)),
            pl.BlockSpec((D, F), lambda i: (0, 0)),
            pl.BlockSpec((1, F), lambda i: (0, 0)),
            pl.BlockSpec((F, D), lambda i: (0, 0)),
            pl.BlockSpec((1, D), lambda i: (0, 0)),
            pl.BlockSpec((1, D), lambda i: (0, 0)),
            pl.BlockSpec((1, D), lambda i: (0, 0)),
        ],
        out_specs=pl.BlockSpec((1, S, D), lambda i: (i, 0, 0)),
        compiler_params=_PARALLEL,
    )(h, w1, b1.reshape(1, F), w2, b2.reshape(1, D),
      gamma.reshape(1, D), beta.reshape(1, D))


# ---------------------------------------------------------------------------
# WholeSequenceModel forward
# ---------------------------------------------------------------------------

def whole_sequence_model_forward(x, params, *, nhead, d_output):
    """x: [B, S, ntoken] (f32) -> [B, S, d_output] (f32)."""
    # Input embedding; sqrt(d_model) is pre-folded into enc_w / enc_b.
    h = pallas_linear(x.astype(jnp.bfloat16), params["enc_w"], params["enc_b"],
                      out_dtype=jnp.bfloat16)
    # TODO(synk): the upstream TransformerModel defines a PositionalEncoding module but
    # does not apply it in forward; it is intentionally omitted here.

    for lp in params["layers"]:
        h = pallas_attention_block(h, lp["in_proj_w"], lp["in_proj_b"],
                                   lp["out_proj_w"], lp["out_proj_b"],
                                   lp["ln1_g"], lp["ln1_b"], nhead=nhead)
        h = pallas_ffn_block(h, lp["ff1_w"], lp["ff1_b"], lp["ff2_w"], lp["ff2_b"],
                             lp["ln2_g"], lp["ln2_b"])

    # Output head (decoder); columns are zero-padded to a lane-dense multiple of 128.
    out = pallas_linear(h, params["dec_w"], params["dec_b"], out_dtype=jnp.float32)
    return out[:, :, :d_output]


# ---------------------------------------------------------------------------
# Deterministic parameter init (PyTorch-equivalent f32) + TPU-friendly prep
# ---------------------------------------------------------------------------

def init_params(key, *, ntoken, d_model, nhead, d_hid, nlayers, d_output):
    del nhead  # shapes do not depend on it
    std = 0.05
    keys = jax.random.split(key, 2 + 4 * nlayers)
    ki = iter(range(len(keys)))

    def rnd(shape):
        return std * jax.random.normal(keys[next(ki)], shape, dtype=jnp.float32)

    params = {
        "enc_w": rnd((ntoken, d_model)),
        "enc_b": jnp.zeros((d_model,), jnp.float32),
        "dec_w": rnd((d_model, d_output)),
        "dec_b": jnp.zeros((d_output,), jnp.float32),
        "layers": [],
    }
    for _ in range(nlayers):
        params["layers"].append({
            "in_proj_w": rnd((d_model, 3 * d_model)),
            "in_proj_b": jnp.zeros((3 * d_model,), jnp.float32),
            "out_proj_w": rnd((d_model, d_model)),
            "out_proj_b": jnp.zeros((d_model,), jnp.float32),
            "ln1_g": jnp.ones((d_model,), jnp.float32),
            "ln1_b": jnp.zeros((d_model,), jnp.float32),
            "ff1_w": rnd((d_model, d_hid)),
            "ff1_b": jnp.zeros((d_hid,), jnp.float32),
            "ff2_w": rnd((d_hid, d_model)),
            "ff2_b": jnp.zeros((d_model,), jnp.float32),
            "ln2_g": jnp.ones((d_model,), jnp.float32),
            "ln2_b": jnp.zeros((d_model,), jnp.float32),
        })
    return params


def prepare_params(raw, *, d_model):
    """Fold sqrt(d_model) into the encoder, pad the decoder to 128 lanes, cast weights
    to bf16 (MXU-native) while keeping biases / LN parameters in f32."""
    sqrt_d = math.sqrt(d_model)
    n_out = raw["dec_w"].shape[1]
    n_pad = _round_up(n_out, 128)
    dec_w = jnp.zeros((d_model, n_pad), jnp.float32).at[:, :n_out].set(raw["dec_w"])
    dec_b = jnp.zeros((n_pad,), jnp.float32).at[:n_out].set(raw["dec_b"])

    params = {
        "enc_w": (raw["enc_w"] * sqrt_d).astype(jnp.bfloat16),
        "enc_b": (raw["enc_b"] * sqrt_d).astype(jnp.float32),
        "dec_w": dec_w.astype(jnp.bfloat16),
        "dec_b": dec_b,
        "layers": [],
    }
    for lp in raw["layers"]:
        params["layers"].append({
            "in_proj_w": lp["in_proj_w"].astype(jnp.bfloat16),
            "in_proj_b": lp["in_proj_b"].astype(jnp.float32),
            "out_proj_w": lp["out_proj_w"].astype(jnp.bfloat16),
            "out_proj_b": lp["out_proj_b"].astype(jnp.float32),
            "ln1_g": lp["ln1_g"].astype(jnp.float32),
            "ln1_b": lp["ln1_b"].astype(jnp.float32),
            "ff1_w": lp["ff1_w"].astype(jnp.bfloat16),
            "ff1_b": lp["ff1_b"].astype(jnp.float32),
            "ff2_w": lp["ff2_w"].astype(jnp.bfloat16),
            "ff2_b": lp["ff2_b"].astype(jnp.float32),
            "ln2_g": lp["ln2_g"].astype(jnp.float32),
            "ln2_b": lp["ln2_b"].astype(jnp.float32),
        })
    return params


if __name__ == "__main__":
    # small shapes consistent with the module's forward: inputs [batch, seq, ntoken]
    B, S, NTOKEN = 2, 8, 16
    D_MODEL, NHEAD, D_HID, NLAYERS, D_OUTPUT = 32, 2, 64, 2, 8

    key = jax.random.PRNGKey(0)
    k_x, k_p = jax.random.split(key)
    x = jax.random.normal(k_x, (B, S, NTOKEN), dtype=jnp.float32)
    raw = init_params(k_p, ntoken=NTOKEN, d_model=D_MODEL, nhead=NHEAD,
                      d_hid=D_HID, nlayers=NLAYERS, d_output=D_OUTPUT)
    params = prepare_params(raw, d_model=D_MODEL)

    fwd = jax.jit(functools.partial(whole_sequence_model_forward,
                                    nhead=NHEAD, d_output=D_OUTPUT))
    out = jax.block_until_ready(fwd(x, params))

    assert out.shape == (B, S, D_OUTPUT), out.shape
    assert bool(jnp.all(jnp.isfinite(out)))
    print("KERNEL_OK")
</pallas_src>

<mosaic_0001>
module attributes {stable_mosaic.version = 11 : i64} {
  func.func @_linear_kernel(%arg0: i32, %arg1: memref<1x8x16xbf16, #tpu.memory_space<vmem>>, %arg2: memref<16x32xbf16, #tpu.memory_space<vmem>>, %arg3: memref<1x32xf32, #tpu.memory_space<vmem>>, %arg4: memref<1x8x32xbf16, #tpu.memory_space<vmem>>) attributes {dimension_semantics = [#tpu.dimension_semantics<parallel>], iteration_bounds = array<i64: 2>, scalar_prefetch = 0 : i64, scratch_operands = 0 : i64, tpu.core_type = #tpu.core_type<tc>, window_params = [{transform_indices = @transform_0, window_bounds = array<i64: 1, 8, 16>}, {pipeline_mode = #tpu.pipeline_mode<synchronous>, transform_indices = @transform_1, window_bounds = array<i64: 16, 32>}, {pipeline_mode = #tpu.pipeline_mode<synchronous>, transform_indices = @transform_2, window_bounds = array<i64: 1, 32>}, {transform_indices = @transform_3, window_bounds = array<i64: 1, 8, 32>}]} {
    %c0 = arith.constant 0 : index
    %c0_0 = arith.constant 0 : index
    %c0_1 = arith.constant 0 : index
    %0 = vector.load %arg1[%c0, %c0_0, %c0_1] : memref<1x8x16xbf16, #tpu.memory_space<vmem>>, vector<1x8x16xbf16>
    %1 = vector.shape_cast %0 : vector<1x8x16xbf16> to vector<8x16xbf16>
    %c0_2 = arith.constant 0 : index
    %c0_3 = arith.constant 0 : index
    %2 = vector.load %arg2[%c0_2, %c0_3] : memref<16x32xbf16, #tpu.memory_space<vmem>>, vector<16x32xbf16>
    %cst = arith.constant dense<0.000000e+00> : vector<8x32xf32>
    %3 = tpu.matmul %1, %2, %cst {dimension_numbers = #tpu.dot_dimension_numbers<[1], [0], [0], [1], [0, 0, 1, 1], [], []>} : vector<8x16xbf16>, vector<16x32xbf16>, vector<8x32xf32> -> vector<8x32xf32>
    %c0_4 = arith.constant 0 : index
    %c0_5 = arith.constant 0 : index
    %4 = vector.load %arg3[%c0_4, %c0_5] : memref<1x32xf32, #tpu.memory_space<vmem>>, vector<1x32xf32>
    %5 = vector.broadcast %4 : vector<1x32xf32> to vector<8x32xf32>
    %6 = arith.addf %3, %5 : vector<8x32xf32>
    %7 = arith.truncf %6 : vector<8x32xf32> to vector<8x32xbf16>
    %c0_6 = arith.constant 0 : index
    %c0_7 = arith.constant 0 : index
    %c0_8 = arith.constant 0 : index
    %8 = vector.load %arg4[%c0_6, %c0_7, %c0_8] : memref<1x8x32xbf16, #tpu.memory_space<vmem>>, vector<1x8x32xbf16>
    %9 = vector.shape_cast %8 : vector<1x8x32xbf16> to vector<8x32xbf16>
    %10 = vector.shape_cast %7 : vector<8x32xbf16> to vector<1x8x32xbf16>
    tpu.vector_store %arg4[%c0_6, %c0_7, %c0_8], %10 {strides = array<i32>} : memref<1x8x32xbf16, #tpu.memory_space<vmem>>, vector<1x8x32xbf16>,
    return
  }
  func.func @transform_0(%arg0: i32) -> (i32, i32, i32) {
    %c0_i32 = arith.constant 0 : i32
    %c0_i32_0 = arith.constant 0 : i32
    %c0_i32_1 = arith.constant 0 : i32
    return %arg0, %c0_i32, %c0_i32_0 : i32, i32, i32
  }
  func.func @transform_1(%arg0: i32) -> (i32, i32) {
    %c0_i32 = arith.constant 0 : i32
    %c0_i32_0 = arith.constant 0 : i32
    %c0_i32_1 = arith.constant 0 : i32
    return %c0_i32, %c0_i32_0 : i32, i32
  }
  func.func @transform_2(%arg0: i32) -> (i32, i32) {
    %c0_i32 = arith.constant 0 : i32
    %c0_i32_0 = arith.constant 0 : i32
    %c0_i32_1 = arith.constant 0 : i32
    return %c0_i32, %c0_i32_0 : i32, i32
  }
  func.func @transform_3(%arg0: i32) -> (i32, i32, i32) {
    %c0_i32 = arith.constant 0 : i32
    %c0_i32_0 = arith.constant 0 : i32
    %c0_i32_1 = arith.constant 0 : i32
    return %arg0, %c0_i32, %c0_i32_0 : i32, i32, i32
  }
}

module attributes {stable_mosaic.version = 11 : i64} {
  func.func @_attn_block_kernel(%arg0: i32, %arg1: memref<1x8x32xbf16, #tpu.memory_space<vmem>>, %arg2: memref<32x96xbf16, #tpu.memory_space<vmem>>, %arg3: memref<1x96xf32, #tpu.memory_space<vmem>>, %arg4: memref<32x32xbf16, #tpu.memory_space<vmem>>, %arg5: memref<1x32xf32, #tpu.memory_space<vmem>>, %arg6: memref<1x32xf32, #tpu.memory_space<vmem>>, %arg7: memref<1x32xf32, #tpu.memory_space<vmem>>, %arg8: memref<1x8x32xbf16, #tpu.memory_space<vmem>>) attributes {dimension_semantics = [#tpu.dimension_semantics<parallel>], iteration_bounds = array<i64: 2>, scalar_prefetch = 0 : i64, scratch_operands = 0 : i64, tpu.core_type = #tpu.core_type<tc>, window_params = [{transform_indices = @transform_0, window_bounds = array<i64: 1, 8, 32>}, {pipeline_mode = #tpu.pipeline_mode<synchronous>, transform_indices = @transform_1, window_bounds = array<i64: 32, 96>}, {pipeline_mode = #tpu.pipeline_mode<synchronous>, transform_indices = @transform_2, window_bounds = array<i64: 1, 96>}, {pipeline_mode = #tpu.pipeline_mode<synchronous>, transform_indices = @transform_3, window_bounds = array<i64: 32, 32>}, {pipeline_mode = #tpu.pipeline_mode<synchronous>, transform_indices = @transform_4, window_bounds = array<i64: 1, 32>}, {pipeline_mode = #tpu.pipeline_mode<synchronous>, transform_indices = @transform_5, window_bounds = array<i64: 1, 32>}, {pipeline_mode = #tpu.pipeline_mode<synchronous>, transform_indices = @transform_6, window_bounds = array<i64: 1, 32>}, {transform_indices = @transform_7, window_bounds = array<i64: 1, 8, 32>}]} {
    %c0 = arith.constant 0 : index
    %c0_0 = arith.constant 0 : index
    %c0_1 = arith.constant 0 : index
    %0 = vector.load %arg1[%c0, %c0_0, %c0_1] : memref<1x8x32xbf16, #tpu.memory_space<vmem>>, vector<1x8x32xbf16>
    %1 = vector.shape_cast %0 : vector<1x8x32xbf16> to vector<8x32xbf16>
    %c0_2 = arith.constant 0 : index
    %c0_3 = arith.constant 0 : index
    %2 = vector.load %arg2[%c0_2, %c0_3] : memref<32x96xbf16, #tpu.memory_space<vmem>>, vector<32x96xbf16>
    %cst = arith.constant dense<0.000000e+00> : vector<8x96xf32>
    %3 = tpu.matmul %1, %2, %cst {dimension_numbers = #tpu.dot_dimension_numbers<[1], [0], [0], [1], [0, 0, 1, 1], [], []>} : vector<8x32xbf16>, vector<32x96xbf16>, vector<8x96xf32> -> vector<8x96xf32>
    %c0_4 = arith.constant 0 : index
    %c0_5 = arith.constant 0 : index
    %4 = vector.load %arg3[%c0_4, %c0_5] : memref<1x96xf32, #tpu.memory_space<vmem>>, vector<1x96xf32>
    %5 = vector.broadcast %4 : vector<1x96xf32> to vector<8x96xf32>
    %6 = arith.addf %3, %5 : vector<8x96xf32>
    %c0_6 = arith.constant 0 : index
    %c0_7 = arith.constant 0 : index
    %7 = vector.load %arg4[%c0_6, %c0_7] : memref<32x32xbf16, #tpu.memory_space<vmem>>, vector<32x32xbf16>
    %cst_8 = arith.constant 0.000000e+00 : f32
    %8 = vector.broadcast %cst_8 : f32 to vector<8x32xf32>
    %9 = vector.extract_strided_slice %6 {offsets = [0, 0], sizes = [8, 16], strides = [1, 1]} : vector<8x96xf32> to vector<8x16xf32>
    %10 = arith.truncf %9 : vector<8x16xf32> to vector<8x16xbf16>
    %11 = vector.extract_strided_slice %6 {offsets = [0, 32], sizes = [8, 16], strides = [1, 1]} : vector<8x96xf32> to vector<8x16xf32>
    %12 = arith.truncf %11 : vector<8x16xf32> to vector<8x16xbf16>
    %13 = vector.extract_strided_slice %6 {offsets = [0, 64], sizes = [8, 16], strides = [1, 1]} : vector<8x96xf32> to vector<8x16xf32>
    %14 = arith.truncf %13 : vector<8x16xf32> to vector<8x16xbf16>
    %15 = tpu.transpose %12, [1, 0] : vector<8x16xbf16> -> vector<16x8xbf16>
    %cst_9 = arith.constant dense<0.000000e+00> : vector<8x8xf32>
    %16 = tpu.matmul %10, %15, %cst_9 {dimension_numbers = #tpu.dot_dimension_numbers<[1], [0], [0], [1], [0, 0, 1, 1], [], []>} : vector<8x16xbf16>, vector<16x8xbf16>, vector<8x8xf32> -> vector<8x8xf32>
    %cst_10 = arith.constant 2.500000e-01 : f32
    %17 = vector.broadcast %cst_10 : f32 to vector<8x8xf32>
    %18 = arith.mulf %16, %17 : vector<8x8xf32>
    %cst_11 = arith.constant dense<0xFF800000> : vector<8xf32>
    %19 = vector.multi_reduction <maximumf>, %18, %cst_11 [1] : vector<8x8xf32> to vector<8xf32>
    %20 = vector.shape_cast %19 : vector<8xf32> to vector<8x1xf32>
    %21 = vector.broadcast %20 : vector<8x1xf32> to vector<8x8xf32>
    %22 = arith.subf %18, %21 : vector<8x8xf32>
    %23 = math.exp %22 : vector<8x8xf32>
    %cst_12 = arith.constant dense<0.000000e+00> : vector<8xf32>
    %24 = vector.multi_reduction <add>, %23, %cst_12 [1] : vector<8x8xf32> to vector<8xf32>
    %25 = vector.shape_cast %24 : vector<8xf32> to vector<8x1xf32>
    %26 = tpu.reciprocal %25 {approx = true} : vector<8x1xf32> -> vector<8x1xf32>
    %27 = vector.broadcast %26 : vector<8x1xf32> to vector<8x8xf32>
    %28 = arith.mulf %23, %27 : vector<8x8xf32>
    %29 = arith.truncf %28 : vector<8x8xf32> to vector<8x8xbf16>
    %cst_13 = arith.constant dense<0.000000e+00> : vector<8x16xf32>
    %30 = tpu.matmul %29, %14, %cst_13 {dimension_numbers = #tpu.dot_dimension_numbers<[1], [0], [0], [1], [0, 0, 1, 1], [], []>} : vector<8x8xbf16>, vector<8x16xbf16>, vector<8x16xf32> -> vector<8x16xf32>
    %31 = arith.truncf %30 : vector<8x16xf32> to vector<8x16xbf16>
    %32 = vector.extract_strided_slice %7 {offsets = [0, 0], sizes = [16, 32], strides = [1, 1]} : vector<32x32xbf16> to vector<16x32xbf16>
    %cst_14 = arith.constant dense<0.000000e+00> : vector<8x32xf32>
    %33 = tpu.matmul %31, %32, %cst_14 {dimension_numbers = #tpu.dot_dimension_numbers<[1], [0], [0], [1], [0, 0, 1, 1], [], []>} : vector<8x16xbf16>, vector<16x32xbf16>, vector<8x32xf32> -> vector<8x32xf32>
    %34 = arith.addf %8, %33 : vector<8x32xf32>
    %35 = vector.extract_strided_slice %6 {offsets = [0, 16], sizes = [8, 16], strides = [1, 1]} : vector<8x96xf32> to vector<8x16xf32>
    %36 = arith.truncf %35 : vector<8x16xf32> to vector<8x16xbf16>
    %37 = vector.extract_strided_slice %6 {offsets = [0, 48], sizes = [8, 16], strides = [1, 1]} : vector<8x96xf32> to vector<8x16xf32>
    %38 = arith.truncf %37 : vector<8x16xf32> to vector<8x16xbf16>
    %39 = vector.extract_strided_slice %6 {offsets = [0, 80], sizes = [8, 16], strides = [1, 1]} : vector<8x96xf32> to vector<8x16xf32>
    %40 = arith.truncf %39 : vector<8x16xf32> to vector<8x16xbf16>
    %41 = tpu.transpose %38, [1, 0] : vector<8x16xbf16> -> vector<16x8xbf16>
    %cst_15 = arith.constant dense<0.000000e+00> : vector<8x8xf32>
    %42 = tpu.matmul %36, %41, %cst_15 {dimension_numbers = #tpu.dot_dimension_numbers<[1], [0], [0], [1], [0, 0, 1, 1], [], []>} : vector<8x16xbf16>, vector<16x8xbf16>, vector<8x8xf32> -> vector<8x8xf32>
    %cst_16 = arith.constant 2.500000e-01 : f32
    %43 = vector.broadcast %cst_16 : f32 to vector<8x8xf32>
    %44 = arith.mulf %42, %43 : vector<8x8xf32>
    %cst_17 = arith.constant dense<0xFF800000> : vector<8xf32>
    %45 = vector.multi_reduction <maximumf>, %44, %cst_17 [1] : vector<8x8xf32> to vector<8xf32>
    %46 = vector.shape_cast %45 : vector<8xf32> to vector<8x1xf32>
    %47 = vector.broadcast %46 : vector<8x1xf32> to vector<8x8xf32>
    %48 = arith.subf %44, %47 : vector<8x8xf32>
    %49 = math.exp %48 : vector<8x8xf32>
    %cst_18 = arith.constant dense<0.000000e+00> : vector<8xf32>
    %50 = vector.multi_reduction <add>, %49, %cst_18 [1] : vector<8x8xf32> to vector<8xf32>
    %51 = vector.shape_cast %50 : vector<8xf32> to vector<8x1xf32>
    %52 = tpu.reciprocal %51 {approx = true} : vector<8x1xf32> -> vector<8x1xf32>
    %53 = vector.broadcast %52 : vector<8x1xf32> to vector<8x8xf32>
    %54 = arith.mulf %49, %53 : vector<8x8xf32>
    %55 = arith.truncf %54 : vector<8x8xf32> to vector<8x8xbf16>
    %cst_19 = arith.constant dense<0.000000e+00> : vector<8x16xf32>
    %56 = tpu.matmul %55, %40, %cst_19 {dimension_numbers = #tpu.dot_dimension_numbers<[1], [0], [0], [1], [0, 0, 1, 1], [], []>} : vector<8x8xbf16>, vector<8x16xbf16>, vector<8x16xf32> -> vector<8x16xf32>
    %57 = arith.truncf %56 : vector<8x16xf32> to vector<8x16xbf16>
    %58 = vector.extract_strided_slice %7 {offsets = [16, 0], sizes = [16, 32], strides = [1, 1]} : vector<32x32xbf16> to vector<16x32xbf16>
    %cst_20 = arith.constant dense<0.000000e+00> : vector<8x32xf32>
    %59 = tpu.matmul %57, %58, %cst_20 {dimension_numbers = #tpu.dot_dimension_numbers<[1], [0], [0], [1], [0, 0, 1, 1], [], []>} : vector<8x16xbf16>, vector<16x32xbf16>, vector<8x32xf32> -> vector<8x32xf32>
    %60 = arith.addf %34, %59 : vector<8x32xf32>
    %c0_21 = arith.constant 0 : index
    %c0_22 = arith.constant 0 : index
    %61 = vector.load %arg5[%c0_21, %c0_22] : memref<1x32xf32, #tpu.memory_space<vmem>>, vector<1x32xf32>
    %62 = vector.broadcast %61 : vector<1x32xf32> to vector<8x32xf32>
    %63 = arith.addf %60, %62 : vector<8x32xf32>
    %64 = arith.extf %1 : vector<8x32xbf16> to vector<8x32xf32>
    %65 = arith.addf %63, %64 : vector<8x32xf32>
    %c0_23 = arith.constant 0 : index
    %c0_24 = arith.constant 0 : index
    %66 = vector.load %arg6[%c0_23, %c0_24] : memref<1x32xf32, #tpu.memory_space<vmem>>, vector<1x32xf32>
    %c0_25 = arith.constant 0 : index
    %c0_26 = arith.constant 0 : index
    %67 = vector.load %arg7[%c0_25, %c0_26] : memref<1x32xf32, #tpu.memory_space<vmem>>, vector<1x32xf32>
    %cst_27 = arith.constant dense<0.000000e+00> : vector<8xf32>
    %68 = vector.multi_reduction <add>, %65, %cst_27 [1] : vector<8x32xf32> to vector<8xf32>
    %69 = vector.shape_cast %68 : vector<8xf32> to vector<8x1xf32>
    %cst_28 = arith.constant 3.200000e+01 : f32
    %70 = vector.broadcast %cst_28 : f32 to vector<8x1xf32>
    %71 = arith.divf %69, %70 : vector<8x1xf32>
    %72 = vector.broadcast %71 : vector<8x1xf32> to vector<8x32xf32>
    %73 = arith.subf %65, %72 : vector<8x32xf32>
    %74 = arith.mulf %73, %73 : vector<8x32xf32>
    %cst_29 = arith.constant dense<0.000000e+00> : vector<8xf32>
    %75 = vector.multi_reduction <add>, %74, %cst_29 [1] : vector<8x32xf32> to vector<8xf32>
    %76 = vector.shape_cast %75 : vector<8xf32> to vector<8x1xf32>
    %cst_30 = arith.constant 3.200000e+01 : f32
    %77 = vector.broadcast %cst_30 : f32 to vector<8x1xf32>
    %78 = arith.divf %76, %77 : vector<8x1xf32>
    %79 = vector.broadcast %71 : vector<8x1xf32> to vector<8x32xf32>
    %80 = arith.subf %65, %79 : vector<8x32xf32>
    %cst_31 = arith.constant 9.99999974E-6 : f32
    %81 = vector.broadcast %cst_31 : f32 to vector<8x1xf32>
    %82 = arith.addf %78, %81 : vector<8x1xf32>
    %83 = math.rsqrt %82 : vector<8x1xf32>
    %84 = vector.broadcast %83 : vector<8x1xf32> to vector<8x32xf32>
    %85 = arith.mulf %80, %84 : vector<8x32xf32>
    %86 = vector.broadcast %66 : vector<1x32xf32> to vector<8x32xf32>
    %87 = arith.mulf %85, %86 : vector<8x32xf32>
    %88 = vector.broadcast %67 : vector<1x32xf32> to vector<8x32xf32>
    %89 = arith.addf %87, %88 : vector<8x32xf32>
    %90 = arith.truncf %89 : vector<8x32xf32> to vector<8x32xbf16>
    %c0_32 = arith.constant 0 : index
    %c0_33 = arith.constant 0 : index
    %c0_34 = arith.constant 0 : index
    %91 = vector.load %arg8[%c0_32, %c0_33, %c0_34] : memref<1x8x32xbf16, #tpu.memory_space<vmem>>, vector<1x8x32xbf16>
    %92 = vector.shape_cast %91 : vector<1x8x32xbf16> to vector<8x32xbf16>
    %93 = vector.shape_cast %90 : vector<8x32xbf16> to vector<1x8x32xbf16>
    tpu.vector_store %arg8[%c0_32, %c0_33, %c0_34], %93 {strides = array<i32>} : memref<1x8x32xbf16, #tpu.memory_space<vmem>>, vector<1x8x32xbf16>,
    return
  }
  func.func @transform_0(%arg0: i32) -> (i32, i32, i32) {
    %c0_i32 = arith.constant 0 : i32
    %c0_i32_0 = arith.constant 0 : i32
    %c0_i32_1 = arith.constant 0 : i32
    return %arg0, %c0_i32, %c0_i32_0 : i32, i32, i32
  }
  func.func @transform_1(%arg0: i32) -> (i32, i32) {
    %c0_i32 = arith.constant 0 : i32
    %c0_i32_0 = arith.constant 0 : i32
    %c0_i32_1 = arith.constant 0 : i32
    return %c0_i32, %c0_i32_0 : i32, i32
  }
  func.func @transform_2(%arg0: i32) -> (i32, i32) {
    %c0_i32 = arith.constant 0 : i32
    %c0_i32_0 = arith.constant 0 : i32
    %c0_i32_1 = arith.constant 0 : i32
    return %c0_i32, %c0_i32_0 : i32, i32
  }
  func.func @transform_3(%arg0: i32) -> (i32, i32) {
    %c0_i32 = arith.constant 0 : i32
    %c0_i32_0 = arith.constant 0 : i32
    %c0_i32_1 = arith.constant 0 : i32
    return %c0_i32, %c0_i32_0 : i32, i32
  }
  func.func @transform_4(%arg0: i32) -> (i32, i32) {
    %c0_i32 = arith.constant 0 : i32
    %c0_i32_0 = arith.constant 0 : i32
    %c0_i32_1 = arith.constant 0 : i32
    return %c0_i32, %c0_i32_0 : i32, i32
  }
  func.func @transform_5(%arg0: i32) -> (i32, i32) {
    %c0_i32 = arith.constant 0 : i32
    %c0_i32_0 = arith.constant 0 : i32
    %c0_i32_1 = arith.constant 0 : i32
    return %c0_i32, %c0_i32_0 : i32, i32
  }
  func.func @transform_6(%arg0: i32) -> (i32, i32) {
    %c0_i32 = arith.constant 0 : i32
    %c0_i32_0 = arith.constant 0 : i32
    %c0_i32_1 = arith.constant 0 : i32
    return %c0_i32, %c0_i32_0 : i32, i32
  }
  func.func @transform_7(%arg0: i32) -> (i32, i32, i32) {
    %c0_i32 = arith.constant 0 : i32
    %c0_i32_0 = arith.constant 0 : i32
    %c0_i32_1 = arith.constant 0 : i32
    return %arg0, %c0_i32, %c0_i32_0 : i32, i32, i32
  }
}

module attributes {stable_mosaic.version = 11 : i64} {
  func.func @_attn_block_kernel(%arg0: i32, %arg1: memref<1x8x32xbf16, #tpu.memory_space<vmem>>, %arg2: memref<32x96xbf16, #tpu.memory_space<vmem>>, %arg3: memref<1x96xf32, #tpu.memory_space<vmem>>, %arg4: memref<32x32xbf16, #tpu.memory_space<vmem>>, %arg5: memref<1x32xf32, #tpu.memory_space<vmem>>, %arg6: memref<1x32xf32, #tpu.memory_space<vmem>>, %arg7: memref<1x32xf32, #tpu.memory_space<vmem>>, %arg8: memref<1x8x32xbf16, #tpu.memory_space<vmem>>) attributes {dimension_semantics = [#tpu.dimension_semantics<parallel>], iteration_bounds = array<i64: 2>, scalar_prefetch = 0 : i64, scratch_operands = 0 : i64, tpu.core_type = #tpu.core_type<tc>, window_params = [{transform_indices = @transform_0, window_bounds = array<i64: 1, 8, 32>}, {pipeline_mode = #tpu.pipeline_mode<synchronous>, transform_indices = @transform_1, window_bounds = array<i64: 32, 96>}, {pipeline_mode = #tpu.pipeline_mode<synchronous>, transform_indices = @transform_2, window_bounds = array<i64: 1, 96>}, {pipeline_mode = #tpu.pipeline_mode<synchronous>, transform_indices = @transform_3, window_bounds = array<i64: 32, 32>}, {pipeline_mode = #tpu.pipeline_mode<synchronous>, transform_indices = @transform_4, window_bounds = array<i64: 1, 32>}, {pipeline_mode = #tpu.pipeline_mode<synchronous>, transform_indices = @transform_5, window_bounds = array<i64: 1, 32>}, {pipeline_mode = #tpu.pipeline_mode<synchronous>, transform_indices = @transform_6, window_bounds = array<i64: 1, 32>}, {transform_indices = @transform_7, window_bounds = array<i64: 1, 8, 32>}]} {
    %c0 = arith.constant 0 : index
    %c0_0 = arith.constant 0 : index
    %c0_1 = arith.constant 0 : index
    %0 = vector.load %arg1[%c0, %c0_0, %c0_1] : memref<1x8x32xbf16, #tpu.memory_space<vmem>>, vector<1x8x32xbf16>
    %1 = vector.shape_cast %0 : vector<1x8x32xbf16> to vector<8x32xbf16>
    %c0_2 = arith.constant 0 : index
    %c0_3 = arith.constant 0 : index
    %2 = vector.load %arg2[%c0_2, %c0_3] : memref<32x96xbf16, #tpu.memory_space<vmem>>, vector<32x96xbf16>
    %cst = arith.constant dense<0.000000e+00> : vector<8x96xf32>
    %3 = tpu.matmul %1, %2, %cst {dimension_numbers = #tpu.dot_dimension_numbers<[1], [0], [0], [1], [0, 0, 1, 1], [], []>} : vector<8x32xbf16>, vector<32x96xbf16>, vector<8x96xf32> -> vector<8x96xf32>
    %c0_4 = arith.constant 0 : index
    %c0_5 = arith.constant 0 : index
    %4 = vector.load %arg3[%c0_4, %c0_5] : memref<1x96xf32, #tpu.memory_space<vmem>>, vector<1x96xf32>
    %5 = vector.broadcast %4 : vector<1x96xf32> to vector<8x96xf32>
    %6 = arith.addf %3, %5 : vector<8x96xf32>
    %c0_6 = arith.constant 0 : index
    %c0_7 = arith.constant 0 : index
    %7 = vector.load %arg4[%c0_6, %c0_7] : memref<32x32xbf16, #tpu.memory_space<vmem>>, vector<32x32xbf16>
    %cst_8 = arith.constant 0.000000e+00 : f32
    %8 = vector.broadcast %cst_8 : f32 to vector<8x32xf32>
    %9 = vector.extract_strided_slice %6 {offsets = [0, 0], sizes = [8, 16], strides = [1, 1]} : vector<8x96xf32> to vector<8x16xf32>
    %10 = arith.truncf %9 : vector<8x16xf32> to vector<8x16xbf16>
    %11 = vector.extract_strided_slice %6 {offsets = [0, 32], sizes = [8, 16], strides = [1, 1]} : vector<8x96xf32> to vector<8x16xf32>
    %12 = arith.truncf %11 : vector<8x16xf32> to vector<8x16xbf16>
    %13 = vector.extract_strided_slice %6 {offsets = [0, 64], sizes = [8, 16], strides = [1, 1]} : vector<8x96xf32> to vector<8x16xf32>
    %14 = arith.truncf %13 : vector<8x16xf32> to vector<8x16xbf16>
    %15 = tpu.transpose %12, [1, 0] : vector<8x16xbf16> -> vector<16x8xbf16>
    %cst_9 = arith.constant dense<0.000000e+00> : vector<8x8xf32>
    %16 = tpu.matmul %10, %15, %cst_9 {dimension_numbers = #tpu.dot_dimension_numbers<[1], [0], [0], [1], [0, 0, 1, 1], [], []>} : vector<8x16xbf16>, vector<16x8xbf16>, vector<8x8xf32> -> vector<8x8xf32>
    %cst_10 = arith.constant 2.500000e-01 : f32
    %17 = vector.broadcast %cst_10 : f32 to vector<8x8xf32>
    %18 = arith.mulf %16, %17 : vector<8x8xf32>
    %cst_11 = arith.constant dense<0xFF800000> : vector<8xf32>
    %19 = vector.multi_reduction <maximumf>, %18, %cst_11 [1] : vector<8x8xf32> to vector<8xf32>
    %20 = vector.shape_cast %19 : vector<8xf32> to vector<8x1xf32>
    %21 = vector.broadcast %20 : vector<8x1xf32> to vector<8x8xf32>
    %22 = arith.subf %18, %21 : vector<8x8xf32>
    %23 = math.exp %22 : vector<8x8xf32>
    %cst_12 = arith.constant dense<0.000000e+00> : vector<8xf32>
    %24 = vector.multi_reduction <add>, %23, %cst_12 [1] : vector<8x8xf32> to vector<8xf32>
    %25 = vector.shape_cast %24 : vector<8xf32> to vector<8x1xf32>
    %26 = tpu.reciprocal %25 {approx = true} : vector<8x1xf32> -> vector<8x1xf32>
    %27 = vector.broadcast %26 : vector<8x1xf32> to vector<8x8xf32>
    %28 = arith.mulf %23, %27 : vector<8x8xf32>
    %29 = arith.truncf %28 : vector<8x8xf32> to vector<8x8xbf16>
    %cst_13 = arith.constant dense<0.000000e+00> : vector<8x16xf32>
    %30 = tpu.matmul %29, %14, %cst_13 {dimension_numbers = #tpu.dot_dimension_numbers<[1], [0], [0], [1], [0, 0, 1, 1], [], []>} : vector<8x8xbf16>, vector<8x16xbf16>, vector<8x16xf32> -> vector<8x16xf32>
    %31 = arith.truncf %30 : vector<8x16xf32> to vector<8x16xbf16>
    %32 = vector.extract_strided_slice %7 {offsets = [0, 0], sizes = [16, 32], strides = [1, 1]} : vector<32x32xbf16> to vector<16x32xbf16>
    %cst_14 = arith.constant dense<0.000000e+00> : vector<8x32xf32>
    %33 = tpu.matmul %31, %32, %cst_14 {dimension_numbers = #tpu.dot_dimension_numbers<[1], [0], [0], [1], [0, 0, 1, 1], [], []>} : vector<8x16xbf16>, vector<16x32xbf16>, vector<8x32xf32> -> vector<8x32xf32>
    %34 = arith.addf %8, %33 : vector<8x32xf32>
    %35 = vector.extract_strided_slice %6 {offsets = [0, 16], sizes = [8, 16], strides = [1, 1]} : vector<8x96xf32> to vector<8x16xf32>
    %36 = arith.truncf %35 : vector<8x16xf32> to vector<8x16xbf16>
    %37 = vector.extract_strided_slice %6 {offsets = [0, 48], sizes = [8, 16], strides = [1, 1]} : vector<8x96xf32> to vector<8x16xf32>
    %38 = arith.truncf %37 : vector<8x16xf32> to vector<8x16xbf16>
    %39 = vector.extract_strided_slice %6 {offsets = [0, 80], sizes = [8, 16], strides = [1, 1]} : vector<8x96xf32> to vector<8x16xf32>
    %40 = arith.truncf %39 : vector<8x16xf32> to vector<8x16xbf16>
    %41 = tpu.transpose %38, [1, 0] : vector<8x16xbf16> -> vector<16x8xbf16>
    %cst_15 = arith.constant dense<0.000000e+00> : vector<8x8xf32>
    %42 = tpu.matmul %36, %41, %cst_15 {dimension_numbers = #tpu.dot_dimension_numbers<[1], [0], [0], [1], [0, 0, 1, 1], [], []>} : vector<8x16xbf16>, vector<16x8xbf16>, vector<8x8xf32> -> vector<8x8xf32>
    %cst_16 = arith.constant 2.500000e-01 : f32
    %43 = vector.broadcast %cst_16 : f32 to vector<8x8xf32>
    %44 = arith.mulf %42, %43 : vector<8x8xf32>
    %cst_17 = arith.constant dense<0xFF800000> : vector<8xf32>
    %45 = vector.multi_reduction <maximumf>, %44, %cst_17 [1] : vector<8x8xf32> to vector<8xf32>
    %46 = vector.shape_cast %45 : vector<8xf32> to vector<8x1xf32>
    %47 = vector.broadcast %46 : vector<8x1xf32> to vector<8x8xf32>
    %48 = arith.subf %44, %47 : vector<8x8xf32>
    %49 = math.exp %48 : vector<8x8xf32>
    %cst_18 = arith.constant dense<0.000000e+00> : vector<8xf32>
    %50 = vector.multi_reduction <add>, %49, %cst_18 [1] : vector<8x8xf32> to vector<8xf32>
    %51 = vector.shape_cast %50 : vector<8xf32> to vector<8x1xf32>
    %52 = tpu.reciprocal %51 {approx = true} : vector<8x1xf32> -> vector<8x1xf32>
    %53 = vector.broadcast %52 : vector<8x1xf32> to vector<8x8xf32>
    %54 = arith.mulf %49, %53 : vector<8x8xf32>
    %55 = arith.truncf %54 : vector<8x8xf32> to vector<8x8xbf16>
    %cst_19 = arith.constant dense<0.000000e+00> : vector<8x16xf32>
    %56 = tpu.matmul %55, %40, %cst_19 {dimension_numbers = #tpu.dot_dimension_numbers<[1], [0], [0], [1], [0, 0, 1, 1], [], []>} : vector<8x8xbf16>, vector<8x16xbf16>, vector<8x16xf32> -> vector<8x16xf32>
    %57 = arith.truncf %56 : vector<8x16xf32> to vector<8x16xbf16>
    %58 = vector.extract_strided_slice %7 {offsets = [16, 0], sizes = [16, 32], strides = [1, 1]} : vector<32x32xbf16> to vector<16x32xbf16>
    %cst_20 = arith.constant dense<0.000000e+00> : vector<8x32xf32>
    %59 = tpu.matmul %57, %58, %cst_20 {dimension_numbers = #tpu.dot_dimension_numbers<[1], [0], [0], [1], [0, 0, 1, 1], [], []>} : vector<8x16xbf16>, vector<16x32xbf16>, vector<8x32xf32> -> vector<8x32xf32>
    %60 = arith.addf %34, %59 : vector<8x32xf32>
    %c0_21 = arith.constant 0 : index
    %c0_22 = arith.constant 0 : index
    %61 = vector.load %arg5[%c0_21, %c0_22] : memref<1x32xf32, #tpu.memory_space<vmem>>, vector<1x32xf32>
    %62 = vector.broadcast %61 : vector<1x32xf32> to vector<8x32xf32>
    %63 = arith.addf %60, %62 : vector<8x32xf32>
    %64 = arith.extf %1 : vector<8x32xbf16> to vector<8x32xf32>
    %65 = arith.addf %63, %64 : vector<8x32xf32>
    %c0_23 = arith.constant 0 : index
    %c0_24 = arith.constant 0 : index
    %66 = vector.load %arg6[%c0_23, %c0_24] : memref<1x32xf32, #tpu.memory_space<vmem>>, vector<1x32xf32>
    %c0_25 = arith.constant 0 : index
    %c0_26 = arith.constant 0 : index
    %67 = vector.load %arg7[%c0_25, %c0_26] : memref<1x32xf32, #tpu.memory_space<vmem>>, vector<1x32xf32>
    %cst_27 = arith.constant dense<0.000000e+00> : vector<8xf32>
    %68 = vector.multi_reduction <add>, %65, %cst_27 [1] : vector<8x32xf32> to vector<8xf32>
    %69 = vector.shape_cast %68 : vector<8xf32> to vector<8x1xf32>
    %cst_28 = arith.constant 3.200000e+01 : f32
    %70 = vector.broadcast %cst_28 : f32 to vector<8x1xf32>
    %71 = arith.divf %69, %70 : vector<8x1xf32>
    %72 = vector.broadcast %71 : vector<8x1xf32> to vector<8x32xf32>
    %73 = arith.subf %65, %72 : vector<8x32xf32>
    %74 = arith.mulf %73, %73 : vector<8x32xf32>
    %cst_29 = arith.constant dense<0.000000e+00> : vector<8xf32>
    %75 = vector.multi_reduction <add>, %74, %cst_29 [1] : vector<8x32xf32> to vector<8xf32>
    %76 = vector.shape_cast %75 : vector<8xf32> to vector<8x1xf32>
    %cst_30 = arith.constant 3.200000e+01 : f32
    %77 = vector.broadcast %cst_30 : f32 to vector<8x1xf32>
    %78 = arith.divf %76, %77 : vector<8x1xf32>
    %79 = vector.broadcast %71 : vector<8x1xf32> to vector<8x32xf32>
    %80 = arith.subf %65, %79 : vector<8x32xf32>
    %cst_31 = arith.constant 9.99999974E-6 : f32
    %81 = vector.broadcast %cst_31 : f32 to vector<8x1xf32>
    %82 = arith.addf %78, %81 : vector<8x1xf32>
    %83 = math.rsqrt %82 : vector<8x1xf32>
    %84 = vector.broadcast %83 : vector<8x1xf32> to vector<8x32xf32>
    %85 = arith.mulf %80, %84 : vector<8x32xf32>
    %86 = vector.broadcast %66 : vector<1x32xf32> to vector<8x32xf32>
    %87 = arith.mulf %85, %86 : vector<8x32xf32>
    %88 = vector.broadcast %67 : vector<1x32xf32> to vector<8x32xf32>
    %89 = arith.addf %87, %88 : vector<8x32xf32>
    %90 = arith.truncf %89 : vector<8x32xf32> to vector<8x32xbf16>
    %c0_32 = arith.constant 0 : index
    %c0_33 = arith.constant 0 : index
    %c0_34 = arith.constant 0 : index
    %91 = vector.load %arg8[%c0_32, %c0_33, %c0_34] : memref<1x8x32xbf16, #tpu.memory_space<vmem>>, vector<1x8x32xbf16>
    %92 = vector.shape_cast %91 : vector<1x8x32xbf16> to vector<8x32xbf16>
    %93 = vector.shape_cast %90 : vector<8x32xbf16> to vector<1x8x32xbf16>
    tpu.vector_store %arg8[%c0_32, %c0_33, %c0_34], %93 {strides = array<i32>} : memref<1x8x32xbf16, #tpu.memory_space<vmem>>, vector<1x8x32xbf16>,
    return
  }
  func.func @transform_0(%arg0: i32) -> (i32, i32, i32) {
    %c0_i32 = arith.constant 0 : i32
    %c0_i32_0 = arith.constant 0 : i32
    %c0_i32_1 = arith.constant 0 : i32
    return %arg0, %c0_i32, %c0_i32_0 : i32, i32, i32
  }
  func.func @transform_1(%arg0: i32) -> (i32, i32) {
    %c0_i32 = arith.constant 0 : i32
    %c0_i32_0 = arith.constant 0 : i32
    %c0_i32_1 = arith.constant 0 : i32
    return %c0_i32, %c0_i32_0 : i32, i32
  }
  func.func @transform_2(%arg0: i32) -> (i32, i32) {
    %c0_i32 = arith.constant 0 : i32
    %c0_i32_0 = arith.constant 0 : i32
    %c0_i32_1 = arith.constant 0 : i32
    return %c0_i32, %c0_i32_0 : i32, i32
  }
  func.func @transform_3(%arg0: i32) -> (i32, i32) {
    %c0_i32 = arith.constant 0 : i32
    %c0_i32_0 = arith.constant 0 : i32
    %c0_i32_1 = arith.constant 0 : i32
    return %c0_i32, %c0_i32_0 : i32, i32
  }
  func.func @transform_4(%arg0: i32) -> (i32, i32) {
    %c0_i32 = arith.constant 0 : i32
    %c0_i32_0 = arith.constant 0 : i32
    %c0_i32_1 = arith.constant 0 : i32
    return %c0_i32, %c0_i32_0 : i32, i32
  }
  func.func @transform_5(%arg0: i32) -> (i32, i32) {
    %c0_i32 = arith.constant 0 : i32
    %c0_i32_0 = arith.constant 0 : i32
    %c0_i32_1 = arith.constant 0 : i32
    return %c0_i32, %c0_i32_0 : i32, i32
  }
  func.func @transform_6(%arg0: i32) -> (i32, i32) {
    %c0_i32 = arith.constant 0 : i32
    %c0_i32_0 = arith.constant 0 : i32
    %c0_i32_1 = arith.constant 0 : i32
    return %c0_i32, %c0_i32_0 : i32, i32
  }
  func.func @transform_7(%arg0: i32) -> (i32, i32, i32) {
    %c0_i32 = arith.constant 0 : i32
    %c0_i32_0 = arith.constant 0 : i32
    %c0_i32_1 = arith.constant 0 : i32
    return %arg0, %c0_i32, %c0_i32_0 : i32, i32, i32
  }
}

module attributes {stable_mosaic.version = 11 : i64} {
  func.func @_ffn_block_kernel(%arg0: i32, %arg1: memref<1x8x32xbf16, #tpu.memory_space<vmem>>, %arg2: memref<32x64xbf16, #tpu.memory_space<vmem>>, %arg3: memref<1x64xf32, #tpu.memory_space<vmem>>, %arg4: memref<64x32xbf16, #tpu.memory_space<vmem>>, %arg5: memref<1x32xf32, #tpu.memory_space<vmem>>, %arg6: memref<1x32xf32, #tpu.memory_space<vmem>>, %arg7: memref<1x32xf32, #tpu.memory_space<vmem>>, %arg8: memref<1x8x32xbf16, #tpu.memory_space<vmem>>) attributes {dimension_semantics = [#tpu.dimension_semantics<parallel>], iteration_bounds = array<i64: 2>, scalar_prefetch = 0 : i64, scratch_operands = 0 : i64, tpu.core_type = #tpu.core_type<tc>, window_params = [{transform_indices = @transform_0, window_bounds = array<i64: 1, 8, 32>}, {pipeline_mode = #tpu.pipeline_mode<synchronous>, transform_indices = @transform_1, window_bounds = array<i64: 32, 64>}, {pipeline_mode = #tpu.pipeline_mode<synchronous>, transform_indices = @transform_2, window_bounds = array<i64: 1, 64>}, {pipeline_mode = #tpu.pipeline_mode<synchronous>, transform_indices = @transform_3, window_bounds = array<i64: 64, 32>}, {pipeline_mode = #tpu.pipeline_mode<synchronous>, transform_indices = @transform_4, window_bounds = array<i64: 1, 32>}, {pipeline_mode = #tpu.pipeline_mode<synchronous>, transform_indices = @transform_5, window_bounds = array<i64: 1, 32>}, {pipeline_mode = #tpu.pipeline_mode<synchronous>, transform_indices = @transform_6, window_bounds = array<i64: 1, 32>}, {transform_indices = @transform_7, window_bounds = array<i64: 1, 8, 32>}]} {
    %c0 = arith.constant 0 : index
    %c0_0 = arith.constant 0 : index
    %c0_1 = arith.constant 0 : index
    %0 = vector.load %arg1[%c0, %c0_0, %c0_1] : memref<1x8x32xbf16, #tpu.memory_space<vmem>>, vector<1x8x32xbf16>
    %1 = vector.shape_cast %0 : vector<1x8x32xbf16> to vector<8x32xbf16>
    %c0_2 = arith.constant 0 : index
    %c0_3 = arith.constant 0 : index
    %2 = vector.load %arg2[%c0_2, %c0_3] : memref<32x64xbf16, #tpu.memory_space<vmem>>, vector<32x64xbf16>
    %cst = arith.constant dense<0.000000e+00> : vector<8x64xf32>
    %3 = tpu.matmul %1, %2, %cst {dimension_numbers = #tpu.dot_dimension_numbers<[1], [0], [0], [1], [0, 0, 1, 1], [], []>} : vector<8x32xbf16>, vector<32x64xbf16>, vector<8x64xf32> -> vector<8x64xf32>
    %c0_4 = arith.constant 0 : index
    %c0_5 = arith.constant 0 : index
    %4 = vector.load %arg3[%c0_4, %c0_5] : memref<1x64xf32, #tpu.memory_space<vmem>>, vector<1x64xf32>
    %5 = vector.broadcast %4 : vector<1x64xf32> to vector<8x64xf32>
    %6 = arith.addf %3, %5 : vector<8x64xf32>
    %cst_6 = arith.constant 0.000000e+00 : f32
    %7 = vector.broadcast %cst_6 : f32 to vector<8x64xf32>
    %8 = arith.maximumf %6, %7 : vector<8x64xf32>
    %9 = arith.truncf %8 : vector<8x64xf32> to vector<8x64xbf16>
    %c0_7 = arith.constant 0 : index
    %c0_8 = arith.constant 0 : index
    %10 = vector.load %arg4[%c0_7, %c0_8] : memref<64x32xbf16, #tpu.memory_space<vmem>>, vector<64x32xbf16>
    %cst_9 = arith.constant dense<0.000000e+00> : vector<8x32xf32>
    %11 = tpu.matmul %9, %10, %cst_9 {dimension_numbers = #tpu.dot_dimension_numbers<[1], [0], [0], [1], [0, 0, 1, 1], [], []>} : vector<8x64xbf16>, vector<64x32xbf16>, vector<8x32xf32> -> vector<8x32xf32>
    %c0_10 = arith.constant 0 : index
    %c0_11 = arith.constant 0 : index
    %12 = vector.load %arg5[%c0_10, %c0_11] : memref<1x32xf32, #tpu.memory_space<vmem>>, vector<1x32xf32>
    %13 = vector.broadcast %12 : vector<1x32xf32> to vector<8x32xf32>
    %14 = arith.addf %11, %13 : vector<8x32xf32>
    %15 = arith.extf %1 : vector<8x32xbf16> to vector<8x32xf32>
    %16 = arith.addf %14, %15 : vector<8x32xf32>
    %c0_12 = arith.constant 0 : index
    %c0_13 = arith.constant 0 : index
    %17 = vector.load %arg6[%c0_12, %c0_13] : memref<1x32xf32, #tpu.memory_space<vmem>>, vector<1x32xf32>
    %c0_14 = arith.constant 0 : index
    %c0_15 = arith.constant 0 : index
    %18 = vector.load %arg7[%c0_14, %c0_15] : memref<1x32xf32, #tpu.memory_space<vmem>>, vector<1x32xf32>
    %cst_16 = arith.constant dense<0.000000e+00> : vector<8xf32>
    %19 = vector.multi_reduction <add>, %16, %cst_16 [1] : vector<8x32xf32> to vector<8xf32>
    %20 = vector.shape_cast %19 : vector<8xf32> to vector<8x1xf32>
    %cst_17 = arith.constant 3.200000e+01 : f32
    %21 = vector.broadcast %cst_17 : f32 to vector<8x1xf32>
    %22 = arith.divf %20, %21 : vector<8x1xf32>
    %23 = vector.broadcast %22 : vector<8x1xf32> to vector<8x32xf32>
    %24 = arith.subf %16, %23 : vector<8x32xf32>
    %25 = arith.mulf %24, %24 : vector<8x32xf32>
    %cst_18 = arith.constant dense<0.000000e+00> : vector<8xf32>
    %26 = vector.multi_reduction <add>, %25, %cst_18 [1] : vector<8x32xf32> to vector<8xf32>
    %27 = vector.shape_cast %26 : vector<8xf32> to vector<8x1xf32>
    %cst_19 = arith.constant 3.200000e+01 : f32
    %28 = vector.broadcast %cst_19 : f32 to vector<8x1xf32>
    %29 = arith.divf %27, %28 : vector<8x1xf32>
    %30 = vector.broadcast %22 : vector<8x1xf32> to vector<8x32xf32>
    %31 = arith.subf %16, %30 : vector<8x32xf32>
    %cst_20 = arith.constant 9.99999974E-6 : f32
    %32 = vector.broadcast %cst_20 : f32 to vector<8x1xf32>
    %33 = arith.addf %29, %32 : vector<8x1xf32>
    %34 = math.rsqrt %33 : vector<8x1xf32>
    %35 = vector.broadcast %34 : vector<8x1xf32> to vector<8x32xf32>
    %36 = arith.mulf %31, %35 : vector<8x32xf32>
    %37 = vector.broadcast %17 : vector<1x32xf32> to vector<8x32xf32>
    %38 = arith.mulf %36, %37 : vector<8x32xf32>
    %39 = vector.broadcast %18 : vector<1x32xf32> to vector<8x32xf32>
    %40 = arith.addf %38, %39 : vector<8x32xf32>
    %41 = arith.truncf %40 : vector<8x32xf32> to vector<8x32xbf16>
    %c0_21 = arith.constant 0 : index
    %c0_22 = arith.constant 0 : index
    %c0_23 = arith.constant 0 : index
    %42 = vector.load %arg8[%c0_21, %c0_22, %c0_23] : memref<1x8x32xbf16, #tpu.memory_space<vmem>>, vector<1x8x32xbf16>
    %43 = vector.shape_cast %42 : vector<1x8x32xbf16> to vector<8x32xbf16>
    %44 = vector.shape_cast %41 : vector<8x32xbf16> to vector<1x8x32xbf16>
    tpu.vector_store %arg8[%c0_21, %c0_22, %c0_23], %44 {strides = array<i32>} : memref<1x8x32xbf16, #tpu.memory_space<vmem>>, vector<1x8x32xbf16>,
    return
  }
  func.func @transform_0(%arg0: i32) -> (i32, i32, i32) {
    %c0_i32 = arith.constant 0 : i32
    %c0_i32_0 = arith.constant 0 : i32
    %c0_i32_1 = arith.constant 0 : i32
    return %arg0, %c0_i32, %c0_i32_0 : i32, i32, i32
  }
  func.func @transform_1(%arg0: i32) -> (i32, i32) {
    %c0_i32 = arith.constant 0 : i32
    %c0_i32_0 = arith.constant 0 : i32
    %c0_i32_1 = arith.constant 0 : i32
    return %c0_i32, %c0_i32_0 : i32, i32
  }
  func.func @transform_2(%arg0: i32) -> (i32, i32) {
    %c0_i32 = arith.constant 0 : i32
    %c0_i32_0 = arith.constant 0 : i32
    %c0_i32_1 = arith.constant 0 : i32
    return %c0_i32, %c0_i32_0 : i32, i32
  }
  func.func @transform_3(%arg0: i32) -> (i32, i32) {
    %c0_i32 = arith.constant 0 : i32
    %c0_i32_0 = arith.constant 0 : i32
    %c0_i32_1 = arith.constant 0 : i32
    return %c0_i32, %c0_i32_0 : i32, i32
  }
  func.func @transform_4(%arg0: i32) -> (i32, i32) {
    %c0_i32 = arith.constant 0 : i32
    %c0_i32_0 = arith.constant 0 : i32
    %c0_i32_1 = arith.constant 0 : i32
    return %c0_i32, %c0_i32_0 : i32, i32
  }
  func.func @transform_5(%arg0: i32) -> (i32, i32) {
    %c0_i32 = arith.constant 0 : i32
    %c0_i32_0 = arith.constant 0 : i32
    %c0_i32_1 = arith.constant 0 : i32
    return %c0_i32, %c0_i32_0 : i32, i32
  }
  func.func @transform_6(%arg0: i32) -> (i32, i32) {
    %c0_i32 = arith.constant 0 : i32
    %c0_i32_0 = arith.constant 0 : i32
    %c0_i32_1 = arith.constant 0 : i32
    return %c0_i32, %c0_i32_0 : i32, i32
  }
  func.func @transform_7(%arg0: i32) -> (i32, i32, i32) {
    %c0_i32 = arith.constant 0 : i32
    %c0_i32_0 = arith.constant 0 : i32
    %c0_i32_1 = arith.constant 0 : i32
    return %arg0, %c0_i32, %c0_i32_0 : i32, i32, i32
  }
}

module attributes {stable_mosaic.version = 11 : i64} {
  func.func @_ffn_block_kernel(%arg0: i32, %arg1: memref<1x8x32xbf16, #tpu.memory_space<vmem>>, %arg2: memref<32x64xbf16, #tpu.memory_space<vmem>>, %arg3: memref<1x64xf32, #tpu.memory_space<vmem>>, %arg4: memref<64x32xbf16, #tpu.memory_space<vmem>>, %arg5: memref<1x32xf32, #tpu.memory_space<vmem>>, %arg6: memref<1x32xf32, #tpu.memory_space<vmem>>, %arg7: memref<1x32xf32, #tpu.memory_space<vmem>>, %arg8: memref<1x8x32xbf16, #tpu.memory_space<vmem>>) attributes {dimension_semantics = [#tpu.dimension_semantics<parallel>], iteration_bounds = array<i64: 2>, scalar_prefetch = 0 : i64, scratch_operands = 0 : i64, tpu.core_type = #tpu.core_type<tc>, window_params = [{transform_indices = @transform_0, window_bounds = array<i64: 1, 8, 32>}, {pipeline_mode = #tpu.pipeline_mode<synchronous>, transform_indices = @transform_1, window_bounds = array<i64: 32, 64>}, {pipeline_mode = #tpu.pipeline_mode<synchronous>, transform_indices = @transform_2, window_bounds = array<i64: 1, 64>}, {pipeline_mode = #tpu.pipeline_mode<synchronous>, transform_indices = @transform_3, window_bounds = array<i64: 64, 32>}, {pipeline_mode = #tpu.pipeline_mode<synchronous>, transform_indices = @transform_4, window_bounds = array<i64: 1, 32>}, {pipeline_mode = #tpu.pipeline_mode<synchronous>, transform_indices = @transform_5, window_bounds = array<i64: 1, 32>}, {pipeline_mode = #tpu.pipeline_mode<synchronous>, transform_indices = @transform_6, window_bounds = array<i64: 1, 32>}, {transform_indices = @transform_7, window_bounds = array<i64: 1, 8, 32>}]} {
    %c0 = arith.constant 0 : index
    %c0_0 = arith.constant 0 : index
    %c0_1 = arith.constant 0 : index
    %0 = vector.load %arg1[%c0, %c0_0, %c0_1] : memref<1x8x32xbf16, #tpu.memory_space<vmem>>, vector<1x8x32xbf16>
    %1 = vector.shape_cast %0 : vector<1x8x32xbf16> to vector<8x32xbf16>
    %c0_2 = arith.constant 0 : index
    %c0_3 = arith.constant 0 : index
    %2 = vector.load %arg2[%c0_2, %c0_3] : memref<32x64xbf16, #tpu.memory_space<vmem>>, vector<32x64xbf16>
    %cst = arith.constant dense<0.000000e+00> : vector<8x64xf32>
    %3 = tpu.matmul %1, %2, %cst {dimension_numbers = #tpu.dot_dimension_numbers<[1], [0], [0], [1], [0, 0, 1, 1], [], []>} : vector<8x32xbf16>, vector<32x64xbf16>, vector<8x64xf32> -> vector<8x64xf32>
    %c0_4 = arith.constant 0 : index
    %c0_5 = arith.constant 0 : index
    %4 = vector.load %arg3[%c0_4, %c0_5] : memref<1x64xf32, #tpu.memory_space<vmem>>, vector<1x64xf32>
    %5 = vector.broadcast %4 : vector<1x64xf32> to vector<8x64xf32>
    %6 = arith.addf %3, %5 : vector<8x64xf32>
    %cst_6 = arith.constant 0.000000e+00 : f32
    %7 = vector.broadcast %cst_6 : f32 to vector<8x64xf32>
    %8 = arith.maximumf %6, %7 : vector<8x64xf32>
    %9 = arith.truncf %8 : vector<8x64xf32> to vector<8x64xbf16>
    %c0_7 = arith.constant 0 : index
    %c0_8 = arith.constant 0 : index
    %10 = vector.load %arg4[%c0_7, %c0_8] : memref<64x32xbf16, #tpu.memory_space<vmem>>, vector<64x32xbf16>
    %cst_9 = arith.constant dense<0.000000e+00> : vector<8x32xf32>
    %11 = tpu.matmul %9, %10, %cst_9 {dimension_numbers = #tpu.dot_dimension_numbers<[1], [0], [0], [1], [0, 0, 1, 1], [], []>} : vector<8x64xbf16>, vector<64x32xbf16>, vector<8x32xf32> -> vector<8x32xf32>
    %c0_10 = arith.constant 0 : index
    %c0_11 = arith.constant 0 : index
    %12 = vector.load %arg5[%c0_10, %c0_11] : memref<1x32xf32, #tpu.memory_space<vmem>>, vector<1x32xf32>
    %13 = vector.broadcast %12 : vector<1x32xf32> to vector<8x32xf32>
    %14 = arith.addf %11, %13 : vector<8x32xf32>
    %15 = arith.extf %1 : vector<8x32xbf16> to vector<8x32xf32>
    %16 = arith.addf %14, %15 : vector<8x32xf32>
    %c0_12 = arith.constant 0 : index
    %c0_13 = arith.constant 0 : index
    %17 = vector.load %arg6[%c0_12, %c0_13] : memref<1x32xf32, #tpu.memory_space<vmem>>, vector<1x32xf32>
    %c0_14 = arith.constant 0 : index
    %c0_15 = arith.constant 0 : index
    %18 = vector.load %arg7[%c0_14, %c0_15] : memref<1x32xf32, #tpu.memory_space<vmem>>, vector<1x32xf32>
    %cst_16 = arith.constant dense<0.000000e+00> : vector<8xf32>
    %19 = vector.multi_reduction <add>, %16, %cst_16 [1] : vector<8x32xf32> to vector<8xf32>
    %20 = vector.shape_cast %19 : vector<8xf32> to vector<8x1xf32>
    %cst_17 = arith.constant 3.200000e+01 : f32
    %21 = vector.broadcast %cst_17 : f32 to vector<8x1xf32>
    %22 = arith.divf %20, %21 : vector<8x1xf32>
    %23 = vector.broadcast %22 : vector<8x1xf32> to vector<8x32xf32>
    %24 = arith.subf %16, %23 : vector<8x32xf32>
    %25 = arith.mulf %24, %24 : vector<8x32xf32>
    %cst_18 = arith.constant dense<0.000000e+00> : vector<8xf32>
    %26 = vector.multi_reduction <add>, %25, %cst_18 [1] : vector<8x32xf32> to vector<8xf32>
    %27 = vector.shape_cast %26 : vector<8xf32> to vector<8x1xf32>
    %cst_19 = arith.constant 3.200000e+01 : f32
    %28 = vector.broadcast %cst_19 : f32 to vector<8x1xf32>
    %29 = arith.divf %27, %28 : vector<8x1xf32>
    %30 = vector.broadcast %22 : vector<8x1xf32> to vector<8x32xf32>
    %31 = arith.subf %16, %30 : vector<8x32xf32>
    %cst_20 = arith.constant 9.99999974E-6 : f32
    %32 = vector.broadcast %cst_20 : f32 to vector<8x1xf32>
    %33 = arith.addf %29, %32 : vector<8x1xf32>
    %34 = math.rsqrt %33 : vector<8x1xf32>
    %35 = vector.broadcast %34 : vector<8x1xf32> to vector<8x32xf32>
    %36 = arith.mulf %31, %35 : vector<8x32xf32>
    %37 = vector.broadcast %17 : vector<1x32xf32> to vector<8x32xf32>
    %38 = arith.mulf %36, %37 : vector<8x32xf32>
    %39 = vector.broadcast %18 : vector<1x32xf32> to vector<8x32xf32>
    %40 = arith.addf %38, %39 : vector<8x32xf32>
    %41 = arith.truncf %40 : vector<8x32xf32> to vector<8x32xbf16>
    %c0_21 = arith.constant 0 : index
    %c0_22 = arith.constant 0 : index
    %c0_23 = arith.constant 0 : index
    %42 = vector.load %arg8[%c0_21, %c0_22, %c0_23] : memref<1x8x32xbf16, #tpu.memory_space<vmem>>, vector<1x8x32xbf16>
    %43 = vector.shape_cast %42 : vector<1x8x32xbf16> to vector<8x32xbf16>
    %44 = vector.shape_cast %41 : vector<8x32xbf16> to vector<1x8x32xbf16>
    tpu.vector_store %arg8[%c0_21, %c0_22, %c0_23], %44 {strides = array<i32>} : memref<1x8x32xbf16, #tpu.memory_space<vmem>>, vector<1x8x32xbf16>,
    return
  }
  func.func @transform_0(%arg0: i32) -> (i32, i32, i32) {
    %c0_i32 = arith.constant 0 : i32
    %c0_i32_0 = arith.constant 0 : i32
    %c0_i32_1 = arith.constant 0 : i32
    return %arg0, %c0_i32, %c0_i32_0 : i32, i32, i32
  }
  func.func @transform_1(%arg0: i32) -> (i32, i32) {
    %c0_i32 = arith.constant 0 : i32
    %c0_i32_0 = arith.constant 0 : i32
    %c0_i32_1 = arith.constant 0 : i32
    return %c0_i32, %c0_i32_0 : i32, i32
  }
  func.func @transform_2(%arg0: i32) -> (i32, i32) {
    %c0_i32 = arith.constant 0 : i32
    %c0_i32_0 = arith.constant 0 : i32
    %c0_i32_1 = arith.constant 0 : i32
    return %c0_i32, %c0_i32_0 : i32, i32
  }
  func.func @transform_3(%arg0: i32) -> (i32, i32) {
    %c0_i32 = arith.constant 0 : i32
    %c0_i32_0 = arith.constant 0 : i32
    %c0_i32_1 = arith.constant 0 : i32
    return %c0_i32, %c0_i32_0 : i32, i32
  }
  func.func @transform_4(%arg0: i32) -> (i32, i32) {
    %c0_i32 = arith.constant 0 : i32
    %c0_i32_0 = arith.constant 0 : i32
    %c0_i32_1 = arith.constant 0 : i32
    return %c0_i32, %c0_i32_0 : i32, i32
  }
  func.func @transform_5(%arg0: i32) -> (i32, i32) {
    %c0_i32 = arith.constant 0 : i32
    %c0_i32_0 = arith.constant 0 : i32
    %c0_i32_1 = arith.constant 0 : i32
    return %c0_i32, %c0_i32_0 : i32, i32
  }
  func.func @transform_6(%arg0: i32) -> (i32, i32) {
    %c0_i32 = arith.constant 0 : i32
    %c0_i32_0 = arith.constant 0 : i32
    %c0_i32_1 = arith.constant 0 : i32
    return %c0_i32, %c0_i32_0 : i32, i32
  }
  func.func @transform_7(%arg0: i32) -> (i32, i32, i32) {
    %c0_i32 = arith.constant 0 : i32
    %c0_i32_0 = arith.constant 0 : i32
    %c0_i32_1 = arith.constant 0 : i32
    return %arg0, %c0_i32, %c0_i32_0 : i32, i32, i32
  }
}

module attributes {stable_mosaic.version = 11 : i64} {
  func.func @_linear_kernel(%arg0: i32, %arg1: memref<1x8x32xbf16, #tpu.memory_space<vmem>>, %arg2: memref<32x128xbf16, #tpu.memory_space<vmem>>, %arg3: memref<1x128xf32, #tpu.memory_space<vmem>>, %arg4: memref<1x8x128xf32, #tpu.memory_space<vmem>>) attributes {dimension_semantics = [#tpu.dimension_semantics<parallel>], iteration_bounds = array<i64: 2>, scalar_prefetch = 0 : i64, scratch_operands = 0 : i64, tpu.core_type = #tpu.core_type<tc>, window_params = [{transform_indices = @transform_0, window_bounds = array<i64: 1, 8, 32>}, {pipeline_mode = #tpu.pipeline_mode<synchronous>, transform_indices = @transform_1, window_bounds = array<i64: 32, 128>}, {pipeline_mode = #tpu.pipeline_mode<synchronous>, transform_indices = @transform_2, window_bounds = array<i64: 1, 128>}, {transform_indices = @transform_3, window_bounds = array<i64: 1, 8, 128>}]} {
    %c0 = arith.constant 0 : index
    %c0_0 = arith.constant 0 : index
    %c0_1 = arith.constant 0 : index
    %0 = vector.load %arg1[%c0, %c0_0, %c0_1] : memref<1x8x32xbf16, #tpu.memory_space<vmem>>, vector<1x8x32xbf16>
    %1 = vector.shape_cast %0 : vector<1x8x32xbf16> to vector<8x32xbf16>
    %c0_2 = arith.constant 0 : index
    %c0_3 = arith.constant 0 : index
    %2 = vector.load %arg2[%c0_2, %c0_3] : memref<32x128xbf16, #tpu.memory_space<vmem>>, vector<32x128xbf16>
    %cst = arith.constant dense<0.000000e+00> : vector<8x128xf32>
    %3 = tpu.matmul %1, %2, %cst {dimension_numbers = #tpu.dot_dimension_numbers<[1], [0], [0], [1], [0, 0, 1, 1], [], []>} : vector<8x32xbf16>, vector<32x128xbf16>, vector<8x128xf32> -> vector<8x128xf32>
    %c0_4 = arith.constant 0 : index
    %c0_5 = arith.constant 0 : index
    %4 = vector.load %arg3[%c0_4, %c0_5] : memref<1x128xf32, #tpu.memory_space<vmem>>, vector<1x128xf32>
    %5 = vector.broadcast %4 : vector<1x128xf32> to vector<8x128xf32>
    %6 = arith.addf %3, %5 : vector<8x128xf32>
    %c0_6 = arith.constant 0 : index
    %c0_7 = arith.constant 0 : index
    %c0_8 = arith.constant 0 : index
    %7 = vector.load %arg4[%c0_6, %c0_7, %c0_8] : memref<1x8x128xf32, #tpu.memory_space<vmem>>, vector<1x8x128xf32>
    %8 = vector.shape_cast %7 : vector<1x8x128xf32> to vector<8x128xf32>
    %9 = vector.shape_cast %6 : vector<8x128xf32> to vector<1x8x128xf32>
    tpu.vector_store %arg4[%c0_6, %c0_7, %c0_8], %9 {strides = array<i32>} : memref<1x8x128xf32, #tpu.memory_space<vmem>>, vector<1x8x128xf32>,
    return
  }
  func.func @transform_0(%arg0: i32) -> (i32, i32, i32) {
    %c0_i32 = arith.constant 0 : i32
    %c0_i32_0 = arith.constant 0 : i32
    %c0_i32_1 = arith.constant 0 : i32
    return %arg0, %c0_i32, %c0_i32_0 : i32, i32, i32
  }
  func.func @transform_1(%arg0: i32) -> (i32, i32) {
    %c0_i32 = arith.constant 0 : i32
    %c0_i32_0 = arith.constant 0 : i32
    %c0_i32_1 = arith.constant 0 : i32
    return %c0_i32, %c0_i32_0 : i32, i32
  }
  func.func @transform_2(%arg0: i32) -> (i32, i32) {
    %c0_i32 = arith.constant 0 : i32
    %c0_i32_0 = arith.constant 0 : i32
    %c0_i32_1 = arith.constant 0 : i32
    return %c0_i32, %c0_i32_0 : i32, i32
  }
  func.func @transform_3(%arg0: i32) -> (i32, i32, i32) {
    %c0_i32 = arith.constant 0 : i32
    %c0_i32_0 = arith.constant 0 : i32
    %c0_i32_1 = arith.constant 0 : i32
    return %arg0, %c0_i32, %c0_i32_0 : i32, i32, i32
  }
}

</mosaic_0001>

<bundles_post_ra>
// kernel: whole_sequence_model_forward.6
= control target key start
LH: loop header
LB: loop body
LE: loop exit
PB: predicated region body
PF: predicated region fallthrough
CT: control target
= control target key end

     0   :  { %8 = vsyncpa [#allocation3], 0  ;;  %s380_s12 = smov 0   ;;  %s403_s0 = inlined_call_operand.vmem [shape: bf16[2,8,16], index: 0, kind: input, shape index: {}]   ;;  %s404_s1 = inlined_call_operand.vmem [shape: bf16[16,32], index: 1, kind: input, shape index: {}]   ;;  %s405_s2 = inlined_call_operand.hbm [shape: f32[1,32], index: 2, kind: input, shape index: {}]   ;;  %s406_s3 = inlined_call_operand.vmem [shape: bf16[2,8,32], index: 3, kind: output, shape index: {}]  }
   0x1 LB: > { %s280_s13 = sadd.s32 4294967295, %s357_s12   ;;  %p282_p0 = scmp.ge.s32.totalorder %s357_s12, 1  ;;  %s357_s12 = sphi %s380_s12, %s14_s12  }
   0x2   : > { %p113_p1 = scmp.lt.s32.totalorder %s357_s12, 3  ;;  %s128_s16 = sshll.u32 %s405_s2, 4  ;;  %s129_s16 = int_to_ptr.hbm [resolvable:$true] %s128_s16 }
   0x3   : > { %p305_p3 = scmp.eq.s32.totalorder %s280_s13, 0  ;;  %s359_s17 = smov [#allocation2]  }
   0x4   : > { %p114_p2 = pnand %p282_p0, %p113_p1  ;;  %s130_s18 = sshll.u32 %s359_s17, 4  ;;  %s131_s18 = int_to_ptr.vmem [resolvable:$true] %s130_s18 }
   0x6   : > { %p301_p4 = pneg %p114_p2  ;;  %150 = sbr.rel (%p114_p2) target bundleno = 152 (0x98), region = 32 }
   0x8   : > { %p302_p5 = pnand %p305_p3, %p301_p4 }
   0xa   : > { %304 = dma.hbm_to_vmem [thread:$0]  (!%p302_p5), %s129_s16, 16, %s131_s18, [#allocation3]  }
   0xb   : > { %352 = dma.done.wait (%p305_p3), [#allocation3], 16  }
   0xc   : > { %354 = vsyncadd (%p305_p3), [#allocation3], 4294967280  ;;  %p173_p6 = scmp.lt.s32.totalorder %s280_s13, 1  ;;  %v296_v0 = vld [vmem:[%s404_s1] sm:$0xff]  ;;  %vm195_vm0 = vcmask 130048   ;;  %vm213_vm1 = vcmask 257024  }
   0xd   : > { %206 = vmatpush.bf16.msra.mxu0 %v296_v0  ;;  %v316_v2 = vld [vmem:[#allocation2] ss:$0 sm:$0xff] }
   0xe   : > { %s408_s13 = smov (!%p173_p6, %s280_s13), 1 }
   0xf   : > { %s287_s19 = sshll.u32 %s408_s13, 2 }
  0x10   : > { %s176_s22 = scalar_lea.vmem %s403_s0, %s287_s19  ;;  %s180_s27 = scalar_lea.vmem %s406_s3, %s287_s19 }
  0x11   : > { %v182_v1 = vld [vmem:[%s176_s22] sm:$0xf] }
  0x12   : > { %293 = vmatmul.msk.bf16.vlgmr.msra.gmra.mxu0 %vm195_vm0, %v182_v1 }
  0x8f   : > { %v208_v3 = vpop.f32.mrf.mxu0 }
  0x90   : > { %v209_v4 = vadd.f32 %v316_v2, %v208_v3 }
  0x92   : > { %v212_v5 = vpack.c.bf16 %v209_v4, %v209_v4 }
  0x94   : > { %214 = vst.msk [vmem:[%s180_s27] sm:$0xf] %vm213_vm1, %v212_v5 }
  0x97   : > { %v210_v6 = vpop.f32.mrf.mxu0 }
  0x98 PF: > { %s14_s12 = sadd.s32 1, %s357_s12  }
  0x99   : > { %p11_p7 = scmp.ge.s32.totalorder %s14_s12, 4  }
  0x9b   :  { %13 = sbr.rel (!%p11_p7) target bundleno = 1 (0x1), region = 67 }
  0xa0   :  { %234 = vsyncpa [#allocation3], 1 }
  0xa1   :  { %236 = vsyncpa [#allocation3 + $0x1], 1 }

// kernel: whole_sequence_model_forward.7
= control target key start
LH: loop header
LB: loop body
LE: loop exit
PB: predicated region body
PF: predicated region fallthrough
CT: control target
= control target key end

     0   :  { %12 = vsyncpa [#allocation3], 0  ;;  %s1096_s0 = inlined_call_operand.vmem [shape: bf16[2,8,32], index: 0, kind: input, shape index: {}]   ;;  %s1097_s1 = inlined_call_operand.hbm [shape: bf16[32,96], index: 1, kind: input, shape index: {}]   ;;  %s1098_s2 = inlined_call_operand.vmem [shape: f32[1,96], index: 2, kind: input, shape index: {}]   ;;  %s1099_s3 = inlined_call_operand.vmem [shape: bf16[32,32], index: 3, kind: input, shape index: {}]   ;;  %s1100_s4 = inlined_call_operand.hbm [shape: f32[1,32], index: 4, kind: input, shape index: {}]   ;;  %s1101_s5 = inlined_call_operand.hbm [shape: f32[1,32], index: 5, kind: input, shape index: {}]   ;;  %s1102_s6 = inlined_call_operand.hbm [shape: f32[1,32], index: 6, kind: input, shape index: {}]   ;;  %s1103_s7 = inlined_call_operand.vmem [shape: bf16[2,8,32], index: 7, kind: output, shape index: {}]  }
   0x1   :  { %13 = vsyncpa [#allocation5], 0 }
   0x2   :  { %14 = vsyncpa [#allocation8], 0  ;;  %s993_s24 = smov 0  }
   0x3 LB: > { %s235_s27 = sshll.u32 %s1100_s4, 4  ;;  %s1002_s28 = sadd.s32 4294967295, %s939_s24   ;;  %s939_s24 = sphi %s993_s24, %s20_s24   ;;  %s236_s27 = int_to_ptr.hbm [resolvable:$true] %s235_s27 }
   0x4   : > { %p686_p0 = scmp.ge.s32.totalorder %s939_s24, 1  ;;  %p203_p1 = scmp.lt.s32.totalorder %s939_s24, 3 }
   0x5   : > { %p757_p2 = scmp.eq.s32.totalorder %s1002_s28, 0  ;;  %s941_s30 = smov [#allocation4]  }
   0x6   : > { %p1007_p3 = pnand %p686_p0, %p203_p1  ;;  %s237_s8 = sshll.u32 %s941_s30, 4  ;;  %s238_s8 = int_to_ptr.vmem [resolvable:$true] %s237_s8 }
   0x7   : > { %s214_s11 = sshll.u32 %s1097_s1, 4  ;;  %s942_s13 = smov [#allocation2]   ;;  %s215_s11 = int_to_ptr.hbm [resolvable:$true] %s214_s11 }
   0x8   : > { %p744_p4 = pneg %p1007_p3  ;;  %s216_s14 = sshll.u32 %s942_s13, 4  ;;  %s217_s14 = int_to_ptr.vmem [resolvable:$true] %s216_s14 }
   0x9   : > { %s247_s17 = sshll.u32 %s1101_s5, 4  ;;  %s943_s18 = smov 64   ;;  %s248_s17 = int_to_ptr.hbm [resolvable:$true] %s247_s17 }
   0xa   : > { %p1018_p5 = pnand %p757_p2, %p744_p4  ;;  %s944_s19 = smov 4  }
   0xb   : > { %s945_s20 = smov [#allocation6]   ;;  %s259_s25 = sshll.u32 %s1102_s6, 4  ;;  %s260_s25 = int_to_ptr.hbm [resolvable:$true] %s259_s25 }
   0xc   : > { %750 = dma.hbm_to_vmem [thread:$0]  (!%p1018_p5), %s236_s27, 16, %s238_s8, [#allocation5]  }
   0xd   : > { %747 = dma.hbm_to_vmem [thread:$0]  (!%p1018_p5), %s215_s11, 256, %s217_s14, [#allocation3], %s943_s18, %s943_s18, %s944_s19  }
   0xe   : > { %s249_s21 = sshll.u32 %s945_s20, 4  ;;  %s946_s26 = smov [#allocation7]   ;;  %s250_s21 = int_to_ptr.vmem [resolvable:$true] %s249_s21 }
   0xf   : > { %753 = dma.hbm_to_vmem [thread:$0]  (!%p1018_p5), %s248_s17, 16, %s250_s21, [#allocation5]  }
  0x10   : > { %s261_s30 = sshll.u32 %s946_s26, 4  ;;  %281 = sbr.rel (%p1007_p3) target bundleno = 1224 (0x4c8), region = 48  ;;  %s262_s30 = int_to_ptr.vmem [resolvable:$true] %s261_s30 }
  0x11   : > { %756 = dma.hbm_to_vmem [thread:$0]  (!%p1018_p5), %s260_s25, 16, %s262_s30, [#allocation8]  }
  0x15   : > { %926 = dma.done.wait (%p757_p2), [#allocation3], 256  }
  0x16   : > { %928 = vsyncadd (%p757_p2), [#allocation3], 4294967040 }
  0x17   : > { %930 = dma.done.wait (%p757_p2), [#allocation5], 32  }
  0x18   : > { %932 = vsyncadd (%p757_p2), [#allocation5], 4294967264 }
  0x19   : > { %934 = dma.done.wait (%p757_p2), [#allocation8], 16  }
  0x1a   : > { %936 = vsyncadd (%p757_p2), [#allocation8], 4294967280  ;;  %p327_p6 = scmp.lt.s32.totalorder %s1002_s28, 1  ;;  %v725_v0 = vld [vmem:[#allocation2 + $0x8] sm:$0xff]  ;;  %v724_v1 = vld [vmem:[#allocation2] sm:$0xff]  ;;  %vm357_vm0 = vcmask 261120  }
  0x1b   : > { %367 = vmatpush.bf16.msra.mxu0 %v725_v0  ;;  %v785_v3 = vld [vmem:[%s1098_s2] ss:$0 sm:$0xff]  ;;  %s947_s12 = smov 112   ;;  %s948_s13 = smov 96   ;;  %vm382_vm1 = vcmask 130048   ;;  %vm421_vm2 = vcmask 1043456  }
  0x1c   : > { %s1107_s28 = smov (!%p327_p6, %s1002_s28), 1  ;;  %s949_s14 = smov 80   ;;  %vm403_vm3 = vcmask 64512   ;;  %v726_v43 = vld [vmem:[%s1099_s3] sm:$0xff]  ;;  %v727_v44 = vld [vmem:[%s1099_s3 + $0x8] sm:$0xff]  ;;  %v952_v61 = vmov 32.0  }
  0x1d   : > { %s697_s27 = sshll.u32 %s1107_s28, 2  ;;  %s950_s15 = smov 64   ;;  %v786_v53 = vld [vmem:[#allocation4] ss:$0 sm:$0xff]  ;;  %vm588_vm8 = vcmask 257024  }
  0x1e   : > { %s330_s9 = scalar_lea.vmem %s1096_s0, %s697_s27  ;;  %s951_s16 = smov 48  }
  0x1f   : > { %368 = vmatpush.bf16.msra.mxu0 %v724_v1  ;;  %v1060_v2 = vld [vmem:[%s330_s9] sm:$0xf]  ;;  %s334_s23 = scalar_lea.vmem %s1103_s7, %s697_s27 }
  0x20   : > { %v546_v55 = vunpack.c.l.bf16 %v1060_v2 }
  0x22   : > { %707 = vmatmul.msk.bf16.vlgmr.msra.gmra.mxu0 %vm357_vm0, %v1060_v2 }
  0x23   : > { %513 = vmatpush.bf16.msrb.mxu0 %v727_v44 }
  0x9f   : > { %v370_v4 = vpop.f32.mrf.mxu0 }
  0xa0   : > { %v371_v5 = vadd.f32 %v785_v3, %v370_v4 }
  0xa2   : > { %v378_v6 = vpack.c.bf16 %v371_v5, %v371_v5 }
  0xa4   : > { %439 = vrot.lane.b32.xlu1 %v378_v6, %s947_s12  ;;  %380 = vrot.lane.b32.xlu0 %v378_v6, %s948_s13 }
  0xa7   : > { %v372_v7 = vpop.f32.mrf.mxu0 }
  0xac   : > { %441 = vrot.lane.b32.xlu0 %v378_v6, %s949_s14 }
  0xb4   : > { %416 = vrot.lane.b32.xlu0 %v378_v6, %s950_s15 }
  0xbc   : > { %475 = vrot.lane.b32.xlu0 %v378_v6, %s951_s16 }
 0x116   : > { %v381_v8 = vpop.permute.xlu0 %380  ;;  %v440_v12 = vpop.permute.xlu1 %439 }
 0x117   : > { %v387_v9 = vsel %vm382_vm1, %v381_v8, 0 }
 0x118   : > { %396 = vmatpush.bf16.xpose.msra.mxu1 %v387_v9 }
 0x11e   : > { %v442_v10 = vpop.permute.xlu0 %441 }
 0x11f   : > { %708 = vmatmul.msk.bf16.vlgmr.msra.gmra.mxu1 %vm382_vm1, %v378_v6  ;;  %v447_v11 = vsel %vm382_vm1, %v442_v10, 0 }
 0x120   : > { %456 = vmatpush.bf16.xpose.msra.mxu3 %v447_v11  ;;  %535 = vmatpush.bf16.msrb.mxu1 %v726_v43 }
 0x126   : > { %v417_v13 = vpop.permute.xlu0 %416 }
 0x127   : > { %710 = vmatmul.msk.bf16.vlgmr.msra.gmra.mxu3 %vm382_vm1, %v440_v12  ;;  %v423_v14 = vsel %vm421_vm2, %v417_v13, 0 }
 0x128   : > { %432 = vmatpush.bf16.msra.mxu2 %v423_v14 }
 0x12e   : > { %v476_v15 = vpop.permute.xlu0 %475 }
 0x12f   : > { %v481_v16 = vsel %vm421_vm2, %v476_v15, 0 }
 0x130   : > { %490 = vmatpush.bf16.msrb.mxu2 %v481_v16 }
 0x19c   : > { %v398_v17 = vpop.f32.mrf.mxu1 }
 0x19d   : > { %v402_v18 = vmul.f32 0.25, %v398_v17 }
 0x19f   : > { %v404_v19 = vsel %vm403_vm3, %v402_v18, -inf }
 0x1a0   : > { %405 = vmax.xlane.f32.xlu1 %v404_v19 }
 0x1a4   : > { %v400_v20 = vpop.f32.mrf.mxu1 }
 0x1a5   : > { %v788_v20 = vld [vmem:[#allocation7] ss:$0 sm:$0xff] }
 0x1aa   : > { %v458_v21 = vpop.f32.mrf.mxu3 }
 0x1ab   : > { %v462_v22 = vmul.f32 0.25, %v458_v21 }
 0x1ad   : > { %v463_v23 = vsel %vm403_vm3, %v462_v22, -inf }
 0x1ae   : > { %464 = vmax.xlane.f32.xlu2 %v463_v23 }
 0x1b2   : > { %v460_v24 = vpop.f32.mrf.mxu3 }
 0x213   : > { %v406_v25 = vpop.xlane.xlu1 %405 }
 0x214   : > { %v407_v26 = vsub.f32 %v402_v18, %v406_v25  ;;  %v787_v18 = vld [vmem:[#allocation6] ss:$0 sm:$0xff] }
 0x216   : > { %v408_v27 = vmul.f32 1.442695, %v407_v26 }
 0x218   : > { %789 = vpow2.f32 %v408_v27 }
 0x21e   : > { %v790_v28 = vpop.eup %789 }
 0x21f   : > { %v410_v29 = vsel %vm403_vm3, %v790_v28, 0.0 }
 0x220   : > { %411 = vadd.xlane.f32.xlu2 %v410_v29 }
 0x221   : > { %v465_v30 = vpop.xlane.xlu2 %464 }
 0x222   : > { %v466_v31 = vsub.f32 %v462_v22, %v465_v30 }
 0x224   : > { %v467_v32 = vmul.f32 1.442695, %v466_v31 }
 0x226   : > { %791 = vpow2.f32 %v467_v32 }
 0x22c   : > { %v792_v33 = vpop.eup %791 }
 0x22d   : > { %v469_v34 = vsel %vm403_vm3, %v792_v33, 0.0 }
 0x22e   : > { %470 = vadd.xlane.f32.xlu2 %v469_v34 }
 0x293   : > { %v412_v35 = vpop.xlane.xlu2 %411 }
 0x294   : > { %793 = vrcp.f32 %v412_v35 }
 0x29a   : > { %v794_v36 = vpop.eup %793 }
 0x29b   : > { %v414_v37 = vmul.f32 %v794_v36, %v790_v28 }
 0x29d   : > { %v415_v38 = vpack.c.bf16 %v414_v37, %v414_v37 }
 0x29f   : > { %709 = vmatmul.msk.bf16.vlgmr.msra.gmra.mxu2 %vm403_vm3, %v415_v38 }
 0x2a1   : > { %v471_v39 = vpop.xlane.xlu2 %470 }
 0x2a2   : > { %795 = vrcp.f32 %v471_v39 }
 0x2a3   : > { %797 = vrcp.f32 %v952_v61 }
 0x2a8   : > { %v796_v40 = vpop.eup %795 }
 0x2a9   : > { %v473_v41 = vmul.f32 %v796_v40, %v792_v33  ;;  %v798_v62 = vpop.eup %797 }
 0x2aa   : > { %v554_v63 = vmul.f32 32.0, %v798_v62  ;;  %vm558_vm4 = vweird.f32 %v798_v62 }
 0x2ab   : > { %v474_v42 = vpack.c.bf16 %v473_v41, %v473_v41 }
 0x2ac   : > { %v555_v0 = vsub.f32 1.0, %v554_v63 }
 0x2ae   : > { %v556_v1 = vmul.f32 %v798_v62, %v555_v0 }
 0x2af   : > { %711 = vmatmul.msk.bf16.vlgmr.msrb.gmra.mxu2 %vm403_vm3, %v474_v42 }
 0x2b0   : > { %v557_v3 = vadd.f32 %v798_v62, %v556_v1 }
 0x2b2   : > { %v559_v4 = vsel %vm558_vm4, %v798_v62, %v557_v3 }
 0x322   : > { %v434_v45 = vpop.f32.mrf.mxu2 }
 0x323   : > { %v438_v46 = vpack.c.bf16 %v434_v45, %v434_v45 }
 0x325   : > { %721 = vmatmul.msk.bf16.vlgmr.msrb.gmra.mxu1 %vm382_vm1, %v438_v46 }
 0x32a   : > { %v436_v47 = vpop.f32.mrf.mxu2 }
 0x332   : > { %v492_v48 = vpop.f32.mrf.mxu2 }
 0x333   : > { %v496_v49 = vpack.c.bf16 %v492_v48, %v492_v48 }
 0x335   : > { %716 = vmatmul.msk.bf16.vlgmr.msrb.gmra.mxu0 %vm382_vm1, %v496_v49 }
 0x33a   : > { %v494_v50 = vpop.f32.mrf.mxu2 }
 0x3a2   : > { %v537_v51 = vpop.f32.mrf.mxu1 }
 0x3aa   : > { %v539_v52 = vpop.f32.mrf.mxu1 }
 0x3b2   : > { %v515_v54 = vpop.f32.mrf.mxu0 }
 0x3b3   : > { %v538_v56 = vadd.f32 %v537_v51, %v515_v54 }
 0x3b5   : > { %v545_v57 = vadd.f32 %v786_v53, %v538_v56 }
 0x3b7   : > { %v547_v58 = vadd.f32 %v546_v55, %v545_v57 }
 0x3b9   : > { %v550_v59 = vsel %vm357_vm0, %v547_v58, 0.0 }
 0x3ba   : > { %551 = vadd.xlane.f32.xlu2 %v550_v59  ;;  %v517_v60 = vpop.f32.mrf.mxu0 }
 0x42d   : > { %v552_v5 = vpop.xlane.xlu2 %551 }
 0x42e   : > { %v560_v6 = vmul.f32 %v559_v4, %v552_v5 }
 0x430   : > { %v561_v7 = vsub.f32 %v547_v58, %v560_v6 }
 0x432   : > { %v562_v2 = vmul.f32 %v561_v7, %v561_v7 }
 0x434   : > { %v563_v8 = vsel %vm357_vm0, %v562_v2, 0.0 }
 0x435   : > { %564 = vadd.xlane.f32.xlu0 %v563_v8 }
 0x4a8   : > { %v565_v9 = vpop.xlane.xlu0 %564 }
 0x4a9   : > { %v566_v10 = vmul.f32 %v565_v9, %v559_v4 }
 0x4ab   : > { %v567_v11 = vadd.f32 1e-05, %v566_v10 }
 0x4ad   : > { %799 = vrsqrt.f32 %v567_v11  ;;  %vm574_vm6 = vweird.f32 %v567_v11 }
 0x4b3   : > { %v800_v12 = vpop.eup %799 }
 0x4b4   : > { %v569_v13 = vmul.f32 %v800_v12, %v567_v11  ;;  %vm575_vm5 = vweird.f32 %v800_v12 }
 0x4b5   : > { %vm576_vm7 = vmor %vm574_vm6, %vm575_vm5 }
 0x4b6   : > { %v570_v14 = vmul.f32 %v800_v12, %v569_v13 }
 0x4b8   : > { %v571_v15 = vmul.f32 0.5, %v570_v14 }
 0x4ba   : > { %v572_v16 = vsub.f32 1.5, %v571_v15 }
 0x4bc   : > { %v573_v17 = vmul.f32 %v800_v12, %v572_v16 }
 0x4be   : > { %v577_v19 = vsel %vm576_vm7, %v800_v12, %v573_v17 }
 0x4bf   : > { %v578_v21 = vmul.f32 %v577_v19, %v561_v7 }
 0x4c1   : > { %v582_v22 = vmul.f32 %v787_v18, %v578_v21 }
 0x4c3   : > { %v586_v23 = vadd.f32 %v788_v20, %v582_v22 }
 0x4c5   : > { %v587_v24 = vpack.c.bf16 %v586_v23, %v586_v23 }
 0x4c7   : > { %589 = vst.msk [vmem:[%s334_s23] sm:$0xf] %vm588_vm8, %v587_v24 }
 0x4c8 PF: > { %s20_s24 = sadd.s32 1, %s939_s24  }
 0x4c9   : > { %p17_p7 = scmp.ge.s32.totalorder %s20_s24, 4  }
 0x4cb   :  { %19 = sbr.rel (!%p17_p7) target bundleno = 3 (0x3), region = 95 }
 0x4d0   :  { %609 = vsyncpa [#allocation3], 1 }
 0x4d1   :  { %611 = vsyncpa [#allocation3 + $0x1], 1 }
 0x4d2   :  { %612 = vsyncpa [#allocation5], 1 }
 0x4d3   :  { %613 = vsyncpa [#allocation8], 1 }

// kernel: whole_sequence_model_forward.8
= control target key start
LH: loop header
LB: loop body
LE: loop exit
PB: predicated region body
PF: predicated region fallthrough
CT: control target
= control target key end

     0   :  { %12 = vsyncpa [#allocation3], 0  ;;  %s789_s0 = inlined_call_operand.vmem [shape: bf16[2,8,32], index: 0, kind: input, shape index: {}]   ;;  %s790_s1 = inlined_call_operand.vmem [shape: bf16[32,64], index: 1, kind: input, shape index: {}]   ;;  %s791_s2 = inlined_call_operand.vmem [shape: f32[1,64], index: 2, kind: input, shape index: {}]   ;;  %s792_s3 = inlined_call_operand.vmem [shape: bf16[64,32], index: 3, kind: input, shape index: {}]   ;;  %s793_s4 = inlined_call_operand.vmem [shape: f32[1,32], index: 4, kind: input, shape index: {}]   ;;  %s794_s5 = inlined_call_operand.hbm [shape: f32[1,32], index: 5, kind: input, shape index: {}]   ;;  %s795_s6 = inlined_call_operand.hbm [shape: f32[1,32], index: 6, kind: input, shape index: {}]   ;;  %s796_s7 = inlined_call_operand.vmem [shape: bf16[2,8,32], index: 7, kind: output, shape index: {}]  }
   0x1   :  { %13 = vsyncpa [#allocation5], 0  ;;  %s719_s24 = smov 0  }
   0x2 LB: > { %s226_s27 = sshll.u32 %s794_s5, 4  ;;  %s517_s28 = sadd.s32 4294967295, %s674_s24   ;;  %s674_s24 = sphi %s719_s24, %s19_s24   ;;  %s227_s27 = int_to_ptr.hbm [resolvable:$true] %s226_s27 }
   0x3   : > { %p519_p0 = scmp.ge.s32.totalorder %s674_s24, 1  ;;  %p202_p1 = scmp.lt.s32.totalorder %s674_s24, 3 }
   0x4   : > { %p577_p2 = scmp.eq.s32.totalorder %s517_s28, 0  ;;  %s676_s30 = smov [#allocation2]  }
   0x5   : > { %p730_p3 = pnand %p519_p0, %p202_p1  ;;  %s228_s8 = sshll.u32 %s676_s30, 4  ;;  %s229_s8 = int_to_ptr.vmem [resolvable:$true] %s228_s8 }
   0x6   : > { %s238_s11 = sshll.u32 %s795_s6, 4  ;;  %s677_s12 = smov [#allocation4]   ;;  %s239_s11 = int_to_ptr.hbm [resolvable:$true] %s238_s11 }
   0x7   : > { %p570_p4 = pneg %p730_p3  ;;  %s240_s13 = sshll.u32 %s677_s12, 4  ;;  %s241_s13 = int_to_ptr.vmem [resolvable:$true] %s240_s13 }
   0x8   : > { %260 = sbr.rel (%p730_p3) target bundleno = 557 (0x22d), region = 48 }
   0x9   : > { %p571_p5 = pnand %p577_p2, %p570_p4 }
   0xb   : > { %573 = dma.hbm_to_vmem [thread:$0]  (!%p571_p5), %s227_s27, 16, %s229_s8, [#allocation3]  }
   0xc   : > { %576 = dma.hbm_to_vmem [thread:$0]  (!%p571_p5), %s239_s11, 16, %s241_s13, [#allocation5]  }
   0xd   : > { %665 = dma.done.wait (%p577_p2), [#allocation3], 16  }
   0xe   : > { %667 = vsyncadd (%p577_p2), [#allocation3], 4294967280 }
   0xf   : > { %669 = dma.done.wait (%p577_p2), [#allocation5], 16  }
  0x10   : > { %671 = vsyncadd (%p577_p2), [#allocation5], 4294967280  ;;  %p296_p6 = scmp.lt.s32.totalorder %s517_s28, 1  ;;  %v557_v0 = vld [vmem:[%s790_s1 + $0x8] sm:$0xff]  ;;  %v561_v1 = vld [vmem:[%s792_s3 + $0x18] sm:$0xff]  ;;  %vm326_vm0 = vcmask 261120  }
  0x11   : > { %336 = vmatpush.bf16.msra.mxu0 %v557_v0  ;;  %v556_v2 = vld [vmem:[%s790_s1] sm:$0xff]  ;;  %389 = vmatpush.bf16.msra.mxu1 %v561_v1  ;;  %v560_v3 = vld [vmem:[%s792_s3 + $0x10] sm:$0xff]  ;;  %v559_v5 = vld [vmem:[%s792_s3 + $0x8] sm:$0xff]  ;;  %vm381_vm1 = vcmask 523264   ;;  %v678_v20 = vmov 32.0   ;;  %vm440_vm6 = vcmask 257024  }
  0x12   : > { %s799_s28 = smov (!%p296_p6, %s517_s28), 1  ;;  %v558_v6 = vld [vmem:[%s792_s3] sm:$0xff]  ;;  %596 = vrcp.f32 %v678_v20 }
  0x13   : > { %s526_s16 = sshll.u32 %s799_s28, 2  ;;  %v592_v7 = vld [vmem:[%s791_s2] ss:$0 sm:$0xff]  ;;  %v595_v43 = vld [vmem:[#allocation4] ss:$0 sm:$0xff] }
  0x14   : > { %s299_s23 = scalar_lea.vmem %s789_s0, %s526_s16  ;;  %v593_v13 = vld [vmem:[%s793_s4] ss:$0 sm:$0xff]  ;;  %s303_s15 = scalar_lea.vmem %s796_s7, %s526_s16 }
  0x15   : > { %337 = vmatpush.bf16.msra.mxu0 %v556_v2  ;;  %v305_v4 = vld [vmem:[%s299_s23] sm:$0xf]  ;;  %390 = vmatpush.bf16.msra.mxu1 %v560_v3 }
  0x16   : > { %v398_v14 = vunpack.c.l.bf16 %v305_v4  ;;  %v594_v41 = vld [vmem:[#allocation2] ss:$0 sm:$0xff] }
  0x18   : > { %536 = vmatmul.msk.bf16.vlgmr.msra.gmra.mxu0 %vm326_vm0, %v305_v4  ;;  %v597_v21 = vpop.eup %596 }
  0x19   : > { %391 = vmatpush.bf16.msra.mxu1 %v559_v5  ;;  %v406_v22 = vmul.f32 32.0, %v597_v21  ;;  %vm410_vm2 = vweird.f32 %v597_v21 }
  0x1b   : > { %v407_v23 = vsub.f32 1.0, %v406_v22 }
  0x1d   : > { %392 = vmatpush.bf16.msra.mxu1 %v558_v6  ;;  %v408_v24 = vmul.f32 %v597_v21, %v407_v23 }
  0x1f   : > { %v409_v25 = vadd.f32 %v597_v21, %v408_v24 }
  0x21   : > { %v411_v26 = vsel %vm410_vm2, %v597_v21, %v409_v25 }
  0x95   : > { %v339_v8 = vpop.f32.mrf.mxu0 }
  0x96   : > { %v340_v9 = vadd.f32 %v592_v7, %v339_v8 }
  0x98   : > { %v343_v10 = vmax.f32 %v340_v9, 0.0 }
  0x9a   : > { %v344_v11 = vpack.c.bf16 %v343_v10, %v343_v10 }
  0x9c   : > { %553 = vmatmul.msk.bf16.vlgmr.msra.gmra.mxu1 %vm381_vm1, %v344_v11 }
  0x9d   : > { %v341_v12 = vpop.f32.mrf.mxu0 }
 0x119   : > { %v394_v15 = vpop.f32.mrf.mxu1 }
 0x11a   : > { %v395_v16 = vadd.f32 %v593_v13, %v394_v15 }
 0x11c   : > { %v399_v17 = vadd.f32 %v398_v14, %v395_v16 }
 0x11e   : > { %v402_v18 = vsel %vm326_vm0, %v399_v17, 0.0 }
 0x11f   : > { %403 = vadd.xlane.f32.xlu0 %v402_v18 }
 0x121   : > { %v396_v19 = vpop.f32.mrf.mxu1 }
 0x192   : > { %v404_v27 = vpop.xlane.xlu0 %403 }
 0x193   : > { %v412_v28 = vmul.f32 %v411_v26, %v404_v27 }
 0x195   : > { %v413_v29 = vsub.f32 %v399_v17, %v412_v28 }
 0x197   : > { %v414_v30 = vmul.f32 %v413_v29, %v413_v29 }
 0x199   : > { %v415_v31 = vsel %vm326_vm0, %v414_v30, 0.0 }
 0x19a   : > { %416 = vadd.xlane.f32.xlu0 %v415_v31 }
 0x20d   : > { %v417_v32 = vpop.xlane.xlu0 %416 }
 0x20e   : > { %v418_v33 = vmul.f32 %v417_v32, %v411_v26 }
 0x210   : > { %v419_v34 = vadd.f32 1e-05, %v418_v33 }
 0x212   : > { %598 = vrsqrt.f32 %v419_v34  ;;  %vm426_vm4 = vweird.f32 %v419_v34 }
 0x218   : > { %v599_v35 = vpop.eup %598 }
 0x219   : > { %v421_v36 = vmul.f32 %v599_v35, %v419_v34  ;;  %vm427_vm3 = vweird.f32 %v599_v35 }
 0x21a   : > { %vm428_vm5 = vmor %vm426_vm4, %vm427_vm3 }
 0x21b   : > { %v422_v37 = vmul.f32 %v599_v35, %v421_v36 }
 0x21d   : > { %v423_v38 = vmul.f32 0.5, %v422_v37 }
 0x21f   : > { %v424_v39 = vsub.f32 1.5, %v423_v38 }
 0x221   : > { %v425_v40 = vmul.f32 %v599_v35, %v424_v39 }
 0x223   : > { %v429_v42 = vsel %vm428_vm5, %v599_v35, %v425_v40 }
 0x224   : > { %v430_v44 = vmul.f32 %v429_v42, %v413_v29 }
 0x226   : > { %v434_v45 = vmul.f32 %v594_v41, %v430_v44 }
 0x228   : > { %v438_v46 = vadd.f32 %v595_v43, %v434_v45 }
 0x22a   : > { %v439_v47 = vpack.c.bf16 %v438_v46, %v438_v46 }
 0x22c   : > { %441 = vst.msk [vmem:[%s303_s15] sm:$0xf] %vm440_vm6, %v439_v47 }
 0x22d PF: > { %s19_s24 = sadd.s32 1, %s674_s24  }
 0x22e   : > { %p16_p7 = scmp.ge.s32.totalorder %s19_s24, 4  }
 0x230   :  { %18 = sbr.rel (!%p16_p7) target bundleno = 2 (0x2), region = 87 }
 0x235   :  { %461 = vsyncpa [#allocation3], 1 }
 0x236   :  { %463 = vsyncpa [#allocation3 + $0x1], 1 }
 0x237   :  { %464 = vsyncpa [#allocation5], 1 }

// kernel: whole_sequence_model_forward.9
= control target key start
LH: loop header
LB: loop body
LE: loop exit
PB: predicated region body
PF: predicated region fallthrough
CT: control target
= control target key end

     0   :  { %12 = vsyncpa [#allocation3], 0  ;;  %s783_s24 = smov 0   ;;  %s847_s0 = inlined_call_operand.vmem [shape: bf16[2,8,32], index: 0, kind: input, shape index: {}]   ;;  %s848_s1 = inlined_call_operand.vmem [shape: bf16[32,96], index: 1, kind: input, shape index: {}]   ;;  %s849_s2 = inlined_call_operand.vmem [shape: f32[1,96], index: 2, kind: input, shape index: {}]   ;;  %s850_s3 = inlined_call_operand.hbm [shape: bf16[32,32], index: 3, kind: input, shape index: {}]   ;;  %s851_s4 = inlined_call_operand.vmem [shape: f32[1,32], index: 4, kind: input, shape index: {}]   ;;  %s852_s5 = inlined_call_operand.vmem [shape: f32[1,32], index: 5, kind: input, shape index: {}]   ;;  %s853_s6 = inlined_call_operand.vmem [shape: f32[1,32], index: 6, kind: input, shape index: {}]   ;;  %s854_s7 = inlined_call_operand.vmem [shape: bf16[2,8,32], index: 7, kind: output, shape index: {}]  }
   0x1 LB: > { %s218_s27 = sshll.u32 %s850_s3, 4  ;;  %s611_s28 = sadd.s32 4294967295, %s732_s24   ;;  %s732_s24 = sphi %s783_s24, %s18_s24   ;;  %s219_s27 = int_to_ptr.hbm [resolvable:$true] %s218_s27 }
   0x2   : > { %p613_p0 = scmp.ge.s32.totalorder %s732_s24, 1  ;;  %p201_p1 = scmp.lt.s32.totalorder %s732_s24, 3 }
   0x3   : > { %p657_p2 = scmp.eq.s32.totalorder %s611_s28, 0  ;;  %s734_s29 = smov [#allocation2]  }
   0x4   : > { %p202_p3 = pnand %p613_p0, %p201_p1  ;;  %s220_s30 = sshll.u32 %s734_s29, 4  ;;  %s221_s30 = int_to_ptr.vmem [resolvable:$true] %s220_s30 }
   0x5   : > { %s735_s8 = smov 64   ;;  %s736_s9 = smov 4  }
   0x6   : > { %p653_p4 = pneg %p202_p3  ;;  %252 = sbr.rel (%p202_p3) target bundleno = 1210 (0x4ba), region = 48 }
   0x8   : > { %p654_p5 = pnand %p657_p2, %p653_p4 }
   0xa   : > { %656 = dma.hbm_to_vmem [thread:$0]  (!%p654_p5), %s219_s27, 256, %s221_s30, [#allocation3], %s735_s8, %s735_s8, %s736_s9  }
   0xb   : > { %727 = dma.done.wait (%p657_p2), [#allocation3], 256  }
   0xc   : > { %729 = vsyncadd (%p657_p2), [#allocation3], 4294967040  ;;  %p283_p6 = scmp.lt.s32.totalorder %s611_s28, 1  ;;  %v646_v0 = vld [vmem:[%s848_s1 + $0x8] sm:$0xff]  ;;  %v645_v1 = vld [vmem:[%s848_s1] sm:$0xff]  ;;  %vm313_vm0 = vcmask 261120  }
   0xd   : > { %323 = vmatpush.bf16.msra.mxu0 %v646_v0  ;;  %v676_v3 = vld [vmem:[%s849_s2] ss:$0 sm:$0xff]  ;;  %s737_s20 = smov 112   ;;  %s738_s21 = smov 96   ;;  %vm338_vm1 = vcmask 130048   ;;  %vm377_vm2 = vcmask 1043456  }
   0xe   : > { %s856_s28 = smov (!%p283_p6, %s611_s28), 1  ;;  %s739_s22 = smov 80   ;;  %vm359_vm3 = vcmask 64512   ;;  %v647_v43 = vld [vmem:[#allocation2] sm:$0xff]  ;;  %v648_v44 = vld [vmem:[#allocation2 + $0x8] sm:$0xff]  ;;  %v742_v61 = vmov 32.0  }
   0xf   : > { %s618_s12 = sshll.u32 %s856_s28, 2  ;;  %s740_s23 = smov 64   ;;  %v677_v53 = vld [vmem:[%s851_s4] ss:$0 sm:$0xff]  ;;  %vm544_vm8 = vcmask 257024  }
  0x10   : > { %s286_s17 = scalar_lea.vmem %s847_s0, %s618_s12  ;;  %s741_s25 = smov 48  }
  0x11   : > { %324 = vmatpush.bf16.msra.mxu0 %v645_v1  ;;  %v808_v2 = vld [vmem:[%s286_s17] sm:$0xf]  ;;  %s290_s13 = scalar_lea.vmem %s854_s7, %s618_s12 }
  0x12   : > { %v502_v55 = vunpack.c.l.bf16 %v808_v2 }
  0x14   : > { %628 = vmatmul.msk.bf16.vlgmr.msra.gmra.mxu0 %vm313_vm0, %v808_v2 }
  0x15   : > { %469 = vmatpush.bf16.msrb.mxu0 %v648_v44 }
  0x91   : > { %v326_v4 = vpop.f32.mrf.mxu0 }
  0x92   : > { %v327_v5 = vadd.f32 %v676_v3, %v326_v4 }
  0x94   : > { %v334_v6 = vpack.c.bf16 %v327_v5, %v327_v5 }
  0x96   : > { %395 = vrot.lane.b32.xlu1 %v334_v6, %s737_s20  ;;  %336 = vrot.lane.b32.xlu0 %v334_v6, %s738_s21 }
  0x99   : > { %v328_v7 = vpop.f32.mrf.mxu0 }
  0x9e   : > { %397 = vrot.lane.b32.xlu0 %v334_v6, %s739_s22 }
  0xa6   : > { %372 = vrot.lane.b32.xlu0 %v334_v6, %s740_s23 }
  0xae   : > { %431 = vrot.lane.b32.xlu0 %v334_v6, %s741_s25 }
 0x108   : > { %v337_v8 = vpop.permute.xlu0 %336  ;;  %v396_v12 = vpop.permute.xlu1 %395 }
 0x109   : > { %v343_v9 = vsel %vm338_vm1, %v337_v8, 0 }
 0x10a   : > { %352 = vmatpush.bf16.xpose.msra.mxu1 %v343_v9 }
 0x110   : > { %v398_v10 = vpop.permute.xlu0 %397 }
 0x111   : > { %629 = vmatmul.msk.bf16.vlgmr.msra.gmra.mxu1 %vm338_vm1, %v334_v6  ;;  %v403_v11 = vsel %vm338_vm1, %v398_v10, 0 }
 0x112   : > { %412 = vmatpush.bf16.xpose.msra.mxu3 %v403_v11  ;;  %491 = vmatpush.bf16.msrb.mxu1 %v647_v43 }
 0x118   : > { %v373_v13 = vpop.permute.xlu0 %372 }
 0x119   : > { %631 = vmatmul.msk.bf16.vlgmr.msra.gmra.mxu3 %vm338_vm1, %v396_v12  ;;  %v379_v14 = vsel %vm377_vm2, %v373_v13, 0 }
 0x11a   : > { %388 = vmatpush.bf16.msra.mxu2 %v379_v14 }
 0x120   : > { %v432_v15 = vpop.permute.xlu0 %431 }
 0x121   : > { %v437_v16 = vsel %vm377_vm2, %v432_v15, 0 }
 0x122   : > { %446 = vmatpush.bf16.msrb.mxu2 %v437_v16 }
 0x18e   : > { %v354_v17 = vpop.f32.mrf.mxu1 }
 0x18f   : > { %v358_v18 = vmul.f32 0.25, %v354_v17 }
 0x191   : > { %v360_v19 = vsel %vm359_vm3, %v358_v18, -inf }
 0x192   : > { %361 = vmax.xlane.f32.xlu1 %v360_v19 }
 0x196   : > { %v356_v20 = vpop.f32.mrf.mxu1 }
 0x197   : > { %v679_v20 = vld [vmem:[%s853_s6] ss:$0 sm:$0xff] }
 0x19c   : > { %v414_v21 = vpop.f32.mrf.mxu3 }
 0x19d   : > { %v418_v22 = vmul.f32 0.25, %v414_v21 }
 0x19f   : > { %v419_v23 = vsel %vm359_vm3, %v418_v22, -inf }
 0x1a0   : > { %420 = vmax.xlane.f32.xlu2 %v419_v23 }
 0x1a4   : > { %v416_v24 = vpop.f32.mrf.mxu3 }
 0x205   : > { %v362_v25 = vpop.xlane.xlu1 %361 }
 0x206   : > { %v363_v26 = vsub.f32 %v358_v18, %v362_v25  ;;  %v678_v18 = vld [vmem:[%s852_s5] ss:$0 sm:$0xff] }
 0x208   : > { %v364_v27 = vmul.f32 1.442695, %v363_v26 }
 0x20a   : > { %680 = vpow2.f32 %v364_v27 }
 0x210   : > { %v681_v28 = vpop.eup %680 }
 0x211   : > { %v366_v29 = vsel %vm359_vm3, %v681_v28, 0.0 }
 0x212   : > { %367 = vadd.xlane.f32.xlu2 %v366_v29 }
 0x213   : > { %v421_v30 = vpop.xlane.xlu2 %420 }
 0x214   : > { %v422_v31 = vsub.f32 %v418_v22, %v421_v30 }
 0x216   : > { %v423_v32 = vmul.f32 1.442695, %v422_v31 }
 0x218   : > { %682 = vpow2.f32 %v423_v32 }
 0x21e   : > { %v683_v33 = vpop.eup %682 }
 0x21f   : > { %v425_v34 = vsel %vm359_vm3, %v683_v33, 0.0 }
 0x220   : > { %426 = vadd.xlane.f32.xlu2 %v425_v34 }
 0x285   : > { %v368_v35 = vpop.xlane.xlu2 %367 }
 0x286   : > { %684 = vrcp.f32 %v368_v35 }
 0x28c   : > { %v685_v36 = vpop.eup %684 }
 0x28d   : > { %v370_v37 = vmul.f32 %v685_v36, %v681_v28 }
 0x28f   : > { %v371_v38 = vpack.c.bf16 %v370_v37, %v370_v37 }
 0x291   : > { %630 = vmatmul.msk.bf16.vlgmr.msra.gmra.mxu2 %vm359_vm3, %v371_v38 }
 0x293   : > { %v427_v39 = vpop.xlane.xlu2 %426 }
 0x294   : > { %686 = vrcp.f32 %v427_v39 }
 0x295   : > { %688 = vrcp.f32 %v742_v61 }
 0x29a   : > { %v687_v40 = vpop.eup %686 }
 0x29b   : > { %v429_v41 = vmul.f32 %v687_v40, %v683_v33  ;;  %v689_v62 = vpop.eup %688 }
 0x29c   : > { %v510_v63 = vmul.f32 32.0, %v689_v62  ;;  %vm514_vm4 = vweird.f32 %v689_v62 }
 0x29d   : > { %v430_v42 = vpack.c.bf16 %v429_v41, %v429_v41 }
 0x29e   : > { %v511_v0 = vsub.f32 1.0, %v510_v63 }
 0x2a0   : > { %v512_v1 = vmul.f32 %v689_v62, %v511_v0 }
 0x2a1   : > { %632 = vmatmul.msk.bf16.vlgmr.msrb.gmra.mxu2 %vm359_vm3, %v430_v42 }
 0x2a2   : > { %v513_v3 = vadd.f32 %v689_v62, %v512_v1 }
 0x2a4   : > { %v515_v4 = vsel %vm514_vm4, %v689_v62, %v513_v3 }
 0x314   : > { %v390_v45 = vpop.f32.mrf.mxu2 }
 0x315   : > { %v394_v46 = vpack.c.bf16 %v390_v45, %v390_v45 }
 0x317   : > { %642 = vmatmul.msk.bf16.vlgmr.msrb.gmra.mxu1 %vm338_vm1, %v394_v46 }
 0x31c   : > { %v392_v47 = vpop.f32.mrf.mxu2 }
 0x324   : > { %v448_v48 = vpop.f32.mrf.mxu2 }
 0x325   : > { %v452_v49 = vpack.c.bf16 %v448_v48, %v448_v48 }
 0x327   : > { %637 = vmatmul.msk.bf16.vlgmr.msrb.gmra.mxu0 %vm338_vm1, %v452_v49 }
 0x32c   : > { %v450_v50 = vpop.f32.mrf.mxu2 }
 0x394   : > { %v493_v51 = vpop.f32.mrf.mxu1 }
 0x39c   : > { %v495_v52 = vpop.f32.mrf.mxu1 }
 0x3a4   : > { %v471_v54 = vpop.f32.mrf.mxu0 }
 0x3a5   : > { %v494_v56 = vadd.f32 %v493_v51, %v471_v54 }
 0x3a7   : > { %v501_v57 = vadd.f32 %v677_v53, %v494_v56 }
 0x3a9   : > { %v503_v58 = vadd.f32 %v502_v55, %v501_v57 }
 0x3ab   : > { %v506_v59 = vsel %vm313_vm0, %v503_v58, 0.0 }
 0x3ac   : > { %507 = vadd.xlane.f32.xlu2 %v506_v59  ;;  %v473_v60 = vpop.f32.mrf.mxu0 }
 0x41f   : > { %v508_v5 = vpop.xlane.xlu2 %507 }
 0x420   : > { %v516_v6 = vmul.f32 %v515_v4, %v508_v5 }
 0x422   : > { %v517_v7 = vsub.f32 %v503_v58, %v516_v6 }
 0x424   : > { %v518_v2 = vmul.f32 %v517_v7, %v517_v7 }
 0x426   : > { %v519_v8 = vsel %vm313_vm0, %v518_v2, 0.0 }
 0x427   : > { %520 = vadd.xlane.f32.xlu0 %v519_v8 }
 0x49a   : > { %v521_v9 = vpop.xlane.xlu0 %520 }
 0x49b   : > { %v522_v10 = vmul.f32 %v521_v9, %v515_v4 }
 0x49d   : > { %v523_v11 = vadd.f32 1e-05, %v522_v10 }
 0x49f   : > { %690 = vrsqrt.f32 %v523_v11  ;;  %vm530_vm6 = vweird.f32 %v523_v11 }
 0x4a5   : > { %v691_v12 = vpop.eup %690 }
 0x4a6   : > { %v525_v13 = vmul.f32 %v691_v12, %v523_v11  ;;  %vm531_vm5 = vweird.f32 %v691_v12 }
 0x4a7   : > { %vm532_vm7 = vmor %vm530_vm6, %vm531_vm5 }
 0x4a8   : > { %v526_v14 = vmul.f32 %v691_v12, %v525_v13 }
 0x4aa   : > { %v527_v15 = vmul.f32 0.5, %v526_v14 }
 0x4ac   : > { %v528_v16 = vsub.f32 1.5, %v527_v15 }
 0x4ae   : > { %v529_v17 = vmul.f32 %v691_v12, %v528_v16 }
 0x4b0   : > { %v533_v19 = vsel %vm532_vm7, %v691_v12, %v529_v17 }
 0x4b1   : > { %v534_v21 = vmul.f32 %v533_v19, %v517_v7 }
 0x4b3   : > { %v538_v22 = vmul.f32 %v678_v18, %v534_v21 }
 0x4b5   : > { %v542_v23 = vadd.f32 %v679_v20, %v538_v22 }
 0x4b7   : > { %v543_v24 = vpack.c.bf16 %v542_v23, %v542_v23 }
 0x4b9   : > { %545 = vst.msk [vmem:[%s290_s13] sm:$0xf] %vm544_vm8, %v543_v24 }
 0x4ba PF: > { %s18_s24 = sadd.s32 1, %s732_s24  }
 0x4bb   : > { %p15_p7 = scmp.ge.s32.totalorder %s18_s24, 4  }
 0x4bd   :  { %17 = sbr.rel (!%p15_p7) target bundleno = 1 (0x1), region = 83 }
 0x4c2   :  { %565 = vsyncpa [#allocation3], 1 }
 0x4c3   :  { %567 = vsyncpa [#allocation3 + $0x1], 1 }

// kernel: whole_sequence_model_forward.11
= control target key start
LH: loop header
LB: loop body
LE: loop exit
PB: predicated region body
PF: predicated region fallthrough
CT: control target
= control target key end

     0   :  { %8 = vsyncpa [#allocation3], 0  ;;  %s520_s0 = inlined_call_operand.vmem [shape: bf16[2,8,32], index: 0, kind: input, shape index: {}]   ;;  %s521_s1 = inlined_call_operand.vmem [shape: bf16[32,128], index: 1, kind: input, shape index: {}]   ;;  %s522_s2 = inlined_call_operand.vmem [shape: f32[1,128], index: 2, kind: input, shape index: {}]   ;;  %s523_s3 = inlined_call_operand.hbm [shape: f32[2,8,128], index: 3, kind: output, shape index: {}]  }
   0x1   :  { %10 = vsyncpa [#allocation3 + $0x1], 0  ;;  %s426_s12 = smov 0   ;;  %s428_s13 = smov 0  }
   0x2   :  { %s430_s14 = smov 0   ;;  %s432_s15 = smov 0  }
   0x3 LB: > { %s447_s16 = sadd.s32 4294967295, %s404_s15   ;;  %s281_s17 = sadd.s32 4294967294, %s404_s15   ;;  %s404_s15 = sphi %s432_s15, %s529_s15   ;;  %s400_s14 = sphi %s430_s14, %s528_s14   ;;  %s396_s13 = sphi %s428_s13, %s527_s13   ;;  %s392_s12 = sphi %s426_s12, %s526_s12  }
   0x4   : > { %s451_s18 = sadd.s32 1, %s404_s15   ;;  %s91_s19 = sadd.s32 1, %s400_s14 }
   0x5   : > { %s88_s20 = ssub.s32 %s404_s15, %s451_s18  ;;  %p101_p0 = scmp.ne.s32.totalorder %s400_s14, %s396_s13 }
   0x6   : > { %p89_p1 = scmp.eq.s32.totalorder %s88_s20, 0  ;;  %p102_p2 = scmp.eq.s32.totalorder %s447_s16, 1 }
   0x7   : > { %p107_p3 = scmp.ne.s32.totalorder %s396_s13, %s392_s12  ;;  %p108_p4 = scmp.eq.s32.totalorder %s281_s17, 1 }
   0x8   : > { %s462_s21 = scalar_select %p89_p1, %s400_s14, %s91_s19  }
   0x9   : > { %p464_p5 = por %p102_p2, %p101_p0  ;;  %p468_p6 = por %p108_p4, %p107_p3 }
   0xa   : > { %p284_p7 = scmp.ge.s32.totalorder %s404_s15, 1  ;;  %p139_p8 = scmp.lt.s32.totalorder %s404_s15, 3 }
   0xc   : > { %p140_p9 = pnand %p284_p7, %p139_p8 }
   0xd   : > { %p162_p10 = scmp.lt.s32.totalorder (!%p140_p9), %s447_s16, 1  ;;  %s159_s6 = sand.u32 (!%p140_p9), 1, %s396_s13  }
   0xe   : > { %143 = sbr.rel (%p140_p9) target bundleno = 161 (0xa1), region = 32  ;;  %s297_s7 = sshll.u32 (!%p140_p9), %s447_s16, 3 }
   0xf   : > { %s285_s8 = sshll.u32 (!%p140_p9), %s159_s6, 3  ;;  %s217_s11 = scalar_lea.hbm (!%p140_p9), %s523_s3, %s297_s7 }
  0x10   : > { %s161_s20 = scalar_lea.vmem (!%p140_p9), [#allocation2], %s285_s8  ;;  %s221_s25 = sshll.u32 (!%p140_p9), %s217_s11, 4  ;;  %s222_s25 = int_to_ptr.hbm [resolvable:$true] %s221_s25 }
  0x11   : > { %s219_s24 = sshll.u32 (!%p140_p9), %s161_s20, 4  ;;  %s207_s26 = scalar_lea.sflag (!%p140_p9), [#allocation3], %s159_s6  ;;  %s220_s24 = int_to_ptr.vmem [resolvable:$true] %s219_s24 }
  0x12   : > { %s362_s30 = scalar_lea.hbm (!%p140_p9), %s523_s3, 16 }
  0x13   : > { %v301_v0 = vld [vmem:[%s521_s1 + $0x8] sm:$0xff]  ;;  %v300_v1 = vld [vmem:[%s521_s1] sm:$0xff]  ;;  %s163_s28 = scalar_select %p162_p10, %s447_s16, 1  ;;  %vm188_vm0 = vcmask 261120  }
  0x14   : > { %198 = vmatpush.bf16.msra.mxu0 %v301_v0  ;;  %v341_v3 = vld [vmem:[%s522_s2] ss:$0 sm:$0xff]  ;;  %s356_s16 = sshra.s32 %s222_s25, 4  ;;  %s357_s16 = int_to_ptr.hbm [resolvable:$true] %s356_s16 }
  0x15   : > { %s286_s29 = sshll.u32 %s163_s28, 2  ;;  %s358_s27 = scalar_lea.hbm %s357_s16, 8 }
  0x16   : > { %s165_s5 = scalar_lea.vmem %s520_s0, %s286_s29  ;;  %p359_p11 = scmp.ne.s32.totalorder %s357_s16, %s358_s27 }
  0x17   : > { %v167_v2 = vld [vmem:[%s165_s5] sm:$0xf]  ;;  %p363_p0 = scmp.lt.s32.totalorder %s357_s16, %s523_s3  ;;  %p364_p1 = scmp.lt.s32.totalorder %s362_s30, %s358_s27 }
  0x18   : > { %199 = vmatpush.bf16.msra.mxu0 %v300_v1  ;;  %p360_p12 = pnand %p359_p11, %p464_p5 }
  0x19   : > { %p365_p2 = por %p364_p1, %p363_p0 }
  0x1a   : > { %p361_p13 = pneg %p360_p12 }
  0x1b   : > { %295 = vmatmul.msk.bf16.vlgmr.msra.gmra.mxu0 %vm188_vm0, %v167_v2 }
  0x1c   : > { %p366_p3 = pnand %p365_p2, %p361_p13 }
  0x98   : > { %v201_v4 = vpop.f32.mrf.mxu0 }
  0x99   : > { %v202_v5 = vadd.f32 %v341_v3, %v201_v4 }
  0x9b   : > { %205 = vst [vmem:[%s161_s20] sm:$0xff] %v202_v5 }
  0x9c   : > { %369 = shalt.err (!%p366_p3)
}
  0x9d   : > { %302 = dma.vmem_to_hbm [thread:$0]  (%p464_p5), %s220_s24, 128, %s222_s25, %s207_s26  }
  0xa0   : > { %v203_v6 = vpop.f32.mrf.mxu0 }
  0xa1 PF: > { %p308_p4 = scmp.ge.s32.totalorder %s404_s15, 2  ;;  %s233_s6 = sand.u32 1, %s392_s12  }
  0xa2   : > { %s234_s7 = scalar_lea.sflag [#allocation3], %s233_s6 }
  0xa3   : > { %p305_p7 = pnand %p308_p4, %p468_p6 }
  0xa5   : > { %p306_p8 = pneg %p305_p7 }
  0xa7   : > { %387 = dma.done.wait (%p306_p8), %s234_s7, 128  }
  0xa8   : > { %389 = vsyncadd (%p306_p8), %s234_s7, 4294967168  ;;  %p13_p9 = scmp.ge.s32.totalorder %s451_s18, 4   ;;  %s526_s12 = smov %s396_s13 }
  0xa9   : > { %s527_s13 = smov %s400_s14  ;;  %s528_s14 = smov %s462_s21 }
  0xaa   : > { %s529_s15 = smov %s451_s18  ;;  %15 = sbr.rel (!%p13_p9) target bundleno = 3 (0x3), region = 67 }
  0xaf   :  { %240 = vsyncpa [#allocation3], 1 }
  0xb0   :  { %242 = vsyncpa [#allocation3 + $0x1], 1 }

// kernel: whole_sequence_model_forward.10
= control target key start
LH: loop header
LB: loop body
LE: loop exit
PB: predicated region body
PF: predicated region fallthrough
CT: control target
= control target key end

     0   :  { %s572_s24 = smov 0   ;;  %s629_s0 = inlined_call_operand.vmem [shape: bf16[2,8,32], index: 0, kind: input, shape index: {}]   ;;  %s630_s1 = inlined_call_operand.vmem [shape: bf16[32,64], index: 1, kind: input, shape index: {}]   ;;  %s631_s2 = inlined_call_operand.vmem [shape: f32[1,64], index: 2, kind: input, shape index: {}]   ;;  %s632_s3 = inlined_call_operand.vmem [shape: bf16[64,32], index: 3, kind: input, shape index: {}]   ;;  %s633_s4 = inlined_call_operand.vmem [shape: f32[1,32], index: 4, kind: input, shape index: {}]   ;;  %s634_s5 = inlined_call_operand.vmem [shape: f32[1,32], index: 5, kind: input, shape index: {}]   ;;  %s635_s6 = inlined_call_operand.vmem [shape: f32[1,32], index: 6, kind: input, shape index: {}]   ;;  %s636_s7 = inlined_call_operand.vmem [shape: bf16[2,8,32], index: 7, kind: output, shape index: {}]  }
   0x1 LB: > { %s465_s25 = sadd.s32 4294967295, %s529_s24   ;;  %p469_p0 = scmp.ge.s32.totalorder %s529_s24, 1  ;;  %s529_s24 = sphi %s572_s24, %s17_s24  }
   0x2   : > { %p236_p1 = scmp.lt.s32.totalorder %s529_s24, 3 }
   0x4   : > { %p237_p2 = pnand %p469_p0, %p236_p1 }
   0x5   : > { %p266_p3 = scmp.lt.s32.totalorder (!%p237_p2), %s465_s25, 1 }
   0x6   : > { %240 = sbr.rel (%p237_p2) target bundleno = 552 (0x228), region = 48 }
   0xb   : > { %v501_v0 = vld [vmem:[%s630_s1 + $0x8] sm:$0xff]  ;;  %v505_v1 = vld [vmem:[%s632_s3 + $0x18] sm:$0xff]  ;;  %v500_v2 = vld [vmem:[%s630_s1] sm:$0xff]  ;;  %s638_s25 = smov (!%p266_p3, %s465_s25), 1  ;;  %vm296_vm0 = vcmask 261120   ;;  %vm351_vm1 = vcmask 523264  }
   0xc   : > { %306 = vmatpush.bf16.msra.mxu0 %v501_v0  ;;  %359 = vmatpush.bf16.msra.mxu1 %v505_v1  ;;  %v504_v3 = vld [vmem:[%s632_s3 + $0x10] sm:$0xff]  ;;  %s470_s11 = sshll.u32 %s638_s25, 2  ;;  %v503_v5 = vld [vmem:[%s632_s3 + $0x8] sm:$0xff]  ;;  %v502_v6 = vld [vmem:[%s632_s3] sm:$0xff]  ;;  %v531_v20 = vmov 32.0   ;;  %vm410_vm6 = vcmask 257024  }
   0xd   : > { %s269_s14 = scalar_lea.vmem %s629_s0, %s470_s11  ;;  %v515_v7 = vld [vmem:[%s631_s2] ss:$0 sm:$0xff]  ;;  %519 = vrcp.f32 %v531_v20  ;;  %s273_s8 = scalar_lea.vmem %s636_s7, %s470_s11 }
   0xe   : > { %v275_v4 = vld [vmem:[%s269_s14] sm:$0xf] }
   0xf   : > { %v516_v13 = vld [vmem:[%s633_s4] ss:$0 sm:$0xff]  ;;  %v368_v14 = vunpack.c.l.bf16 %v275_v4 }
  0x10   : > { %307 = vmatpush.bf16.msra.mxu0 %v500_v2  ;;  %360 = vmatpush.bf16.msra.mxu1 %v504_v3  ;;  %v517_v41 = vld [vmem:[%s634_s5] ss:$0 sm:$0xff] }
  0x11   : > { %v518_v43 = vld [vmem:[%s635_s6] ss:$0 sm:$0xff] }
  0x13   : > { %480 = vmatmul.msk.bf16.vlgmr.msra.gmra.mxu0 %vm296_vm0, %v275_v4  ;;  %v520_v21 = vpop.eup %519 }
  0x14   : > { %361 = vmatpush.bf16.msra.mxu1 %v503_v5  ;;  %v376_v22 = vmul.f32 32.0, %v520_v21  ;;  %vm380_vm2 = vweird.f32 %v520_v21 }
  0x16   : > { %v377_v23 = vsub.f32 1.0, %v376_v22 }
  0x18   : > { %362 = vmatpush.bf16.msra.mxu1 %v502_v6  ;;  %v378_v24 = vmul.f32 %v520_v21, %v377_v23 }
  0x1a   : > { %v379_v25 = vadd.f32 %v520_v21, %v378_v24 }
  0x1c   : > { %v381_v26 = vsel %vm380_vm2, %v520_v21, %v379_v25 }
  0x90   : > { %v309_v8 = vpop.f32.mrf.mxu0 }
  0x91   : > { %v310_v9 = vadd.f32 %v515_v7, %v309_v8 }
  0x93   : > { %v313_v10 = vmax.f32 %v310_v9, 0.0 }
  0x95   : > { %v314_v11 = vpack.c.bf16 %v313_v10, %v313_v10 }
  0x97   : > { %497 = vmatmul.msk.bf16.vlgmr.msra.gmra.mxu1 %vm351_vm1, %v314_v11 }
  0x98   : > { %v311_v12 = vpop.f32.mrf.mxu0 }
 0x114   : > { %v364_v15 = vpop.f32.mrf.mxu1 }
 0x115   : > { %v365_v16 = vadd.f32 %v516_v13, %v364_v15 }
 0x117   : > { %v369_v17 = vadd.f32 %v368_v14, %v365_v16 }
 0x119   : > { %v372_v18 = vsel %vm296_vm0, %v369_v17, 0.0 }
 0x11a   : > { %373 = vadd.xlane.f32.xlu0 %v372_v18 }
 0x11c   : > { %v366_v19 = vpop.f32.mrf.mxu1 }
 0x18d   : > { %v374_v27 = vpop.xlane.xlu0 %373 }
 0x18e   : > { %v382_v28 = vmul.f32 %v381_v26, %v374_v27 }
 0x190   : > { %v383_v29 = vsub.f32 %v369_v17, %v382_v28 }
 0x192   : > { %v384_v30 = vmul.f32 %v383_v29, %v383_v29 }
 0x194   : > { %v385_v31 = vsel %vm296_vm0, %v384_v30, 0.0 }
 0x195   : > { %386 = vadd.xlane.f32.xlu0 %v385_v31 }
 0x208   : > { %v387_v32 = vpop.xlane.xlu0 %386 }
 0x209   : > { %v388_v33 = vmul.f32 %v387_v32, %v381_v26 }
 0x20b   : > { %v389_v34 = vadd.f32 1e-05, %v388_v33 }
 0x20d   : > { %521 = vrsqrt.f32 %v389_v34  ;;  %vm396_vm4 = vweird.f32 %v389_v34 }
 0x213   : > { %v522_v35 = vpop.eup %521 }
 0x214   : > { %v391_v36 = vmul.f32 %v522_v35, %v389_v34  ;;  %vm397_vm3 = vweird.f32 %v522_v35 }
 0x215   : > { %vm398_vm5 = vmor %vm396_vm4, %vm397_vm3 }
 0x216   : > { %v392_v37 = vmul.f32 %v522_v35, %v391_v36 }
 0x218   : > { %v393_v38 = vmul.f32 0.5, %v392_v37 }
 0x21a   : > { %v394_v39 = vsub.f32 1.5, %v393_v38 }
 0x21c   : > { %v395_v40 = vmul.f32 %v522_v35, %v394_v39 }
 0x21e   : > { %v399_v42 = vsel %vm398_vm5, %v522_v35, %v395_v40 }
 0x21f   : > { %v400_v44 = vmul.f32 %v399_v42, %v383_v29 }
 0x221   : > { %v404_v45 = vmul.f32 %v517_v41, %v400_v44 }
 0x223   : > { %v408_v46 = vadd.f32 %v518_v43, %v404_v45 }
 0x225   : > { %v409_v47 = vpack.c.bf16 %v408_v46, %v408_v46 }
 0x227   : > { %411 = vst.msk [vmem:[%s273_s8] sm:$0xf] %vm410_vm6, %v409_v47 }
 0x228 PF: > { %s17_s24 = sadd.s32 1, %s529_s24  }
 0x229   : > { %p14_p4 = scmp.ge.s32.totalorder %s17_s24, 4  }
 0x22b   :  { %16 = sbr.rel (!%p14_p4) target bundleno = 1 (0x1), region = 78 }

</bundles_post_ra>
